<compile_context>
chip_gen: v5e
topology: v5e:2x2
jax: 0.10.0
libtpu: 0.0.40
codegen_flags: <defaults>
</compile_context>

<pallas_src>
import jax
import jax.numpy as jnp
from jax.experimental import pallas as pl
from jax.experimental.pallas import tpu as pltpu

D_IN = 1      # GRU input_size
H_RNN = 16    # GRU hidden size
G_ALL = 3 * H_RNN   # 48 gate lanes, order (r, z, n)
N_OUT = 5     # fc out features


def _gru_last_step_kernel(seqs_ref, wpack_ref, vpack_ref, out_ref, gi_ref):
    tB, T = seqs_ref.shape
    H = H_RNN
    G = G_ALL

    x = seqs_ref[...]                                   # (tB, T), T on lanes

    # Packed small operands.
    w_ih_row = vpack_ref[0:1, :]                        # (1, G)  W_ih (input_size==1)
    gb_i_row = vpack_ref[1:2, :]                        # (1, G)  [b_ih+b_hh]_{r,z} ++ b_ih_n
    gb_h_row = vpack_ref[2:3, :]                        # (1, G)  zeros_{r,z} ++ b_hh_n
    b_fc_row = vpack_ref[3:4, :N_OUT]                   # (1, 5)
    whh_all = wpack_ref[:, :G]                          # (H, G)  fused r,z,n h-projection
    w_fc = wpack_ref[:, G:]                             # (H, 5)

    # ---- hoisted, h-independent input projection (prologue, off the chain) --
    # input_size == 1 -> outer product == VPU broadcast-multiply.  Written
    # time-major into VMEM scratch so each timestep does one leading-axis vld.
    for t in range(T):
        gi_ref[t] = x[:, t:t + 1] * w_ih_row + gb_i_row          # (tB, G)

    # Hoist the broadcast (JAX does not CSE broadcast_in_dim inside loops).
    gb_h_b = jnp.broadcast_to(gb_h_row, (tB, G))

    # ---- serial GRU recurrence: ONE fused (tB,H)x(H,3H) matmul per step ----
    h = jnp.zeros((tB, H), jnp.float32)
    for t in range(T):                                   # T static -> fully unrolled
        gi_t = gi_ref[t]                                 # (tB, G) single vld
        gh = jnp.dot(h, whh_all, preferred_element_type=jnp.float32) + gb_h_b
        rz = jax.nn.sigmoid(gi_t[:, :2 * H] + gh[:, :2 * H])     # fused r,z sigmoid
        r = rz[:, :H]
        z = rz[:, H:]
        n = jnp.tanh(gi_t[:, 2 * H:] + r * gh[:, 2 * H:])        # b_hh_n already in gh
        h = (1.0 - z) * n + z * h

    # relu(GRU outputs)[:, -1, :] == relu(h_T); then fc: 16 -> 5.
    out_ref[...] = (jnp.dot(jax.nn.relu(h), w_fc,
                            preferred_element_type=jnp.float32) + b_fc_row)


def _round_down8(x):
    return max(8, (x // 8) * 8)


def _num_tensorcores_per_chip():
    try:
        dev = jax.devices()[0]
        n = getattr(dev, "num_cores", None)
        if n:
            return int(n)
        if "v7" in str(getattr(dev, "device_kind", "")).lower():
            return 2
    except Exception:
        pass
    return 1


def _pick_block_b(B, block_b):
    if B <= 8:
        return B
    if block_b is not None:
        return min(_round_down8(block_b), _round_down8(B))
    tB = min(128, _round_down8(B))
    # v7x megacore: keep >=2 parallel grid steps so both TensorCores are used.
    if _num_tensorcores_per_chip() >= 2 and B >= 16:
        tB = min(tB, _round_down8(B // 2))
    return tB


def my_rnn2_forward(seqs, kp, *, block_b=None):
    """seqs: (B, T, 1) f32 batch-first; kp: dict from prepare_kernel_params."""
    B, T, D = seqs.shape
    assert D == D_IN

    x2d = seqs.reshape(B, T).astype(jnp.float32)   # drop degenerate input dim (metadata only)

    tB = _pick_block_b(B, block_b)
    B_pad = ((B + tB - 1) // tB) * tB
    if B_pad != B:
        x2d = jnp.pad(x2d, ((0, B_pad - B), (0, 0)))   # ragged batch -> zero-pad tail tile

    out = pl.pallas_call(
        _gru_last_step_kernel,
        out_shape=jax.ShapeDtypeStruct((B_pad, N_OUT), jnp.float32),
        grid_spec=pltpu.PrefetchScalarGridSpec(
            num_scalar_prefetch=0,
            grid=(B_pad // tB,),
            in_specs=[
                pl.BlockSpec((tB, T), lambda b: (b, 0)),
                pl.BlockSpec(kp["w_pack"].shape, lambda b: (0, 0)),
                pl.BlockSpec(kp["v_pack"].shape, lambda b: (0, 0)),
            ],
            out_specs=pl.BlockSpec((tB, N_OUT), lambda b: (b, 0)),
            scratch_shapes=[pltpu.VMEM((T, tB, G_ALL), jnp.float32)],
        ),
        # Working set is ~1 MiB at tB=128, T=16 -> well under every default
        # scoped-VMEM limit; set vmem_limit_bytes here only if tB/T are scaled
        # up together (v7x has 64 MiB physical VMEM).
        compiler_params=pltpu.CompilerParams(
            dimension_semantics=("parallel",)),
    )(x2d, kp["w_pack"], kp["v_pack"])

    return out[:B] if B_pad != B else out


def make_params(key):
    """Deterministic synthetic parameters, stored pre-transposed to (in, out)."""
    ks = jax.random.split(key, 6)
    s = 0.1
    return {
        # GRU weight_ih_l0: PyTorch (3H, 1) -> stored (1, 3H); gate order r,z,n
        "w_ih": jax.random.normal(ks[0], (D_IN, 3 * H_RNN), jnp.float32) * s,
        "b_ih": jax.random.normal(ks[1], (1, 3 * H_RNN), jnp.float32) * s,
        # GRU weight_hh_l0: PyTorch (3H, H) -> stored (H, 3H)
        "w_hh": jax.random.normal(ks[2], (H_RNN, 3 * H_RNN), jnp.float32) * s,
        "b_hh": jax.random.normal(ks[3], (1, 3 * H_RNN), jnp.float32) * s,
        # fc: Linear(16, 5): PyTorch (5, 16) -> stored (16, 5)
        "w_fc": jax.random.normal(ks[4], (H_RNN, N_OUT), jnp.float32) * s,
        "b_fc": jax.random.normal(ks[5], (1, N_OUT), jnp.float32) * s,
    }


def prepare_kernel_params(p):
    """One-time weight repack into two kernel operands.

    W_pack (H, 3H+5) = [W_hh(r,z,n) | W_fc]
    V_pack (4, 3H)   = [ W_ih row ;
                         gi bias row  = (b_ih+b_hh)_{r,z} ++ b_ih_n ;
                         gh bias row  = zeros_{r,z}       ++ b_hh_n ;
                         b_fc (zero-padded to 3H) ]
    """
    H = H_RNN
    gb_i = jnp.concatenate(
        [p["b_ih"][:, :2 * H] + p["b_hh"][:, :2 * H], p["b_ih"][:, 2 * H:]], axis=1)
    gb_h = jnp.concatenate(
        [jnp.zeros((1, 2 * H), jnp.float32), p["b_hh"][:, 2 * H:]], axis=1)
    b_fc_pad = jnp.concatenate(
        [p["b_fc"], jnp.zeros((1, 3 * H - N_OUT), jnp.float32)], axis=1)

    v_pack = jnp.concatenate([p["w_ih"], gb_i, gb_h, b_fc_pad], axis=0)   # (4, 3H)
    w_pack = jnp.concatenate([p["w_hh"], p["w_fc"]], axis=1)              # (H, 3H+5)
    return {"w_pack": w_pack, "v_pack": v_pack}


def reference_forward(seqs, p):
    """Pure-JAX reference replicating the PyTorch forward (for validation)."""
    B, T, D = seqs.shape
    H = H_RNN

    def step(h, x_t):
        gi = x_t @ p["w_ih"] + p["b_ih"]
        gh = h @ p["w_hh"] + p["b_hh"]
        r = jax.nn.sigmoid(gi[:, :H] + gh[:, :H])
        z = jax.nn.sigmoid(gi[:, H:2 * H] + gh[:, H:2 * H])
        n = jnp.tanh(gi[:, 2 * H:] + r * gh[:, 2 * H:])
        return (1.0 - z) * n + z * h, None

    h0 = jnp.zeros((B, H), jnp.float32)
    h_last, _ = jax.lax.scan(step, h0, jnp.transpose(seqs, (1, 0, 2)))
    return jax.nn.relu(h_last) @ p["w_fc"] + p["b_fc"]


if __name__ == "__main__":
    B, T, D = 8, 16, D_IN       # batch, seq len, input_size=1 (as in the module)

    key = jax.random.PRNGKey(0)
    k_params, k_seqs = jax.random.split(key)

    params = make_params(k_params)
    kparams = prepare_kernel_params(params)     # one-time weight repack
    seqs = jax.random.normal(k_seqs, (B, T, D), jnp.float32)

    out = my_rnn2_forward(seqs, kparams)
    out = jax.block_until_ready(out)

    ref = reference_forward(seqs, params)
    assert out.shape == (B, N_OUT)
    assert jnp.allclose(out, ref, rtol=1e-4, atol=1e-4), "mismatch vs reference"

    print("KERNEL_OK")
</pallas_src>

<mosaic_0001>
module attributes {stable_mosaic.version = 11 : i64} {
  func.func @_gru_last_step_kernel(%arg0: i32, %arg1: memref<8x16xf32, #tpu.memory_space<vmem>>, %arg2: memref<16x53xf32, #tpu.memory_space<vmem>>, %arg3: memref<4x48xf32, #tpu.memory_space<vmem>>, %arg4: memref<8x5xf32, #tpu.memory_space<vmem>>, %arg5: memref<16x8x48xf32, #tpu.memory_space<vmem>>) attributes {dimension_semantics = [#tpu.dimension_semantics<parallel>], iteration_bounds = array<i64: 1>, scalar_prefetch = 0 : i64, scratch_operands = 1 : i64, tpu.core_type = #tpu.core_type<tc>, window_params = [{transform_indices = @transform_0, window_bounds = array<i64: 8, 16>}, {pipeline_mode = #tpu.pipeline_mode<synchronous>, transform_indices = @transform_1, window_bounds = array<i64: 16, 53>}, {pipeline_mode = #tpu.pipeline_mode<synchronous>, transform_indices = @transform_2, window_bounds = array<i64: 4, 48>}, {transform_indices = @transform_3, window_bounds = array<i64: 8, 5>}]} {
    %c0 = arith.constant 0 : index
    %c0_0 = arith.constant 0 : index
    %0 = vector.load %arg1[%c0, %c0_0] : memref<8x16xf32, #tpu.memory_space<vmem>>, vector<8x16xf32>
    %c0_1 = arith.constant 0 : index
    %c0_2 = arith.constant 0 : index
    %1 = vector.load %arg3[%c0_1, %c0_2] : memref<4x48xf32, #tpu.memory_space<vmem>>, vector<1x48xf32>
    %c1 = arith.constant 1 : index
    %c0_3 = arith.constant 0 : index
    %2 = vector.load %arg3[%c1, %c0_3] : memref<4x48xf32, #tpu.memory_space<vmem>>, vector<1x48xf32>
    %c2 = arith.constant 2 : index
    %c0_4 = arith.constant 0 : index
    %3 = vector.load %arg3[%c2, %c0_4] : memref<4x48xf32, #tpu.memory_space<vmem>>, vector<1x48xf32>
    %c3 = arith.constant 3 : index
    %c0_5 = arith.constant 0 : index
    %4 = vector.load %arg3[%c3, %c0_5] : memref<4x48xf32, #tpu.memory_space<vmem>>, vector<1x5xf32>
    %c0_6 = arith.constant 0 : index
    %c0_7 = arith.constant 0 : index
    %5 = vector.load %arg2[%c0_6, %c0_7] : memref<16x53xf32, #tpu.memory_space<vmem>>, vector<16x48xf32>
    %c0_8 = arith.constant 0 : index
    %c48 = arith.constant 48 : index
    %6 = vector.load %arg2[%c0_8, %c48] : memref<16x53xf32, #tpu.memory_space<vmem>>, vector<16x5xf32>
    %7 = vector.extract_strided_slice %0 {offsets = [0, 0], sizes = [8, 1], strides = [1, 1]} : vector<8x16xf32> to vector<8x1xf32>
    %8 = vector.broadcast %7 : vector<8x1xf32> to vector<8x48xf32>
    %9 = vector.broadcast %1 : vector<1x48xf32> to vector<8x48xf32>
    %10 = arith.mulf %8, %9 : vector<8x48xf32>
    %11 = vector.broadcast %2 : vector<1x48xf32> to vector<8x48xf32>
    %12 = arith.addf %10, %11 : vector<8x48xf32>
    %c0_9 = arith.constant 0 : index
    %c0_10 = arith.constant 0 : index
    %c0_11 = arith.constant 0 : index
    %13 = vector.load %arg5[%c0_9, %c0_10, %c0_11] : memref<16x8x48xf32, #tpu.memory_space<vmem>>, vector<1x8x48xf32>
    %14 = vector.shape_cast %13 : vector<1x8x48xf32> to vector<8x48xf32>
    %15 = vector.shape_cast %12 : vector<8x48xf32> to vector<1x8x48xf32>
    tpu.vector_store %arg5[%c0_9, %c0_10, %c0_11], %15 {strides = array<i32>} : memref<16x8x48xf32, #tpu.memory_space<vmem>>, vector<1x8x48xf32>,
    %16 = vector.extract_strided_slice %0 {offsets = [0, 1], sizes = [8, 1], strides = [1, 1]} : vector<8x16xf32> to vector<8x1xf32>
    %17 = vector.broadcast %16 : vector<8x1xf32> to vector<8x48xf32>
    %18 = vector.broadcast %1 : vector<1x48xf32> to vector<8x48xf32>
    %19 = arith.mulf %17, %18 : vector<8x48xf32>
    %20 = vector.broadcast %2 : vector<1x48xf32> to vector<8x48xf32>
    %21 = arith.addf %19, %20 : vector<8x48xf32>
    %c1_12 = arith.constant 1 : index
    %c0_13 = arith.constant 0 : index
    %c0_14 = arith.constant 0 : index
    %22 = vector.load %arg5[%c1_12, %c0_13, %c0_14] : memref<16x8x48xf32, #tpu.memory_space<vmem>>, vector<1x8x48xf32>
    %23 = vector.shape_cast %22 : vector<1x8x48xf32> to vector<8x48xf32>
    %24 = vector.shape_cast %21 : vector<8x48xf32> to vector<1x8x48xf32>
    tpu.vector_store %arg5[%c1_12, %c0_13, %c0_14], %24 {strides = array<i32>} : memref<16x8x48xf32, #tpu.memory_space<vmem>>, vector<1x8x48xf32>,
    %25 = vector.extract_strided_slice %0 {offsets = [0, 2], sizes = [8, 1], strides = [1, 1]} : vector<8x16xf32> to vector<8x1xf32>
    %26 = vector.broadcast %25 : vector<8x1xf32> to vector<8x48xf32>
    %27 = vector.broadcast %1 : vector<1x48xf32> to vector<8x48xf32>
    %28 = arith.mulf %26, %27 : vector<8x48xf32>
    %29 = vector.broadcast %2 : vector<1x48xf32> to vector<8x48xf32>
    %30 = arith.addf %28, %29 : vector<8x48xf32>
    %c2_15 = arith.constant 2 : index
    %c0_16 = arith.constant 0 : index
    %c0_17 = arith.constant 0 : index
    %31 = vector.load %arg5[%c2_15, %c0_16, %c0_17] : memref<16x8x48xf32, #tpu.memory_space<vmem>>, vector<1x8x48xf32>
    %32 = vector.shape_cast %31 : vector<1x8x48xf32> to vector<8x48xf32>
    %33 = vector.shape_cast %30 : vector<8x48xf32> to vector<1x8x48xf32>
    tpu.vector_store %arg5[%c2_15, %c0_16, %c0_17], %33 {strides = array<i32>} : memref<16x8x48xf32, #tpu.memory_space<vmem>>, vector<1x8x48xf32>,
    %34 = vector.extract_strided_slice %0 {offsets = [0, 3], sizes = [8, 1], strides = [1, 1]} : vector<8x16xf32> to vector<8x1xf32>
    %35 = vector.broadcast %34 : vector<8x1xf32> to vector<8x48xf32>
    %36 = vector.broadcast %1 : vector<1x48xf32> to vector<8x48xf32>
    %37 = arith.mulf %35, %36 : vector<8x48xf32>
    %38 = vector.broadcast %2 : vector<1x48xf32> to vector<8x48xf32>
    %39 = arith.addf %37, %38 : vector<8x48xf32>
    %c3_18 = arith.constant 3 : index
    %c0_19 = arith.constant 0 : index
    %c0_20 = arith.constant 0 : index
    %40 = vector.load %arg5[%c3_18, %c0_19, %c0_20] : memref<16x8x48xf32, #tpu.memory_space<vmem>>, vector<1x8x48xf32>
    %41 = vector.shape_cast %40 : vector<1x8x48xf32> to vector<8x48xf32>
    %42 = vector.shape_cast %39 : vector<8x48xf32> to vector<1x8x48xf32>
    tpu.vector_store %arg5[%c3_18, %c0_19, %c0_20], %42 {strides = array<i32>} : memref<16x8x48xf32, #tpu.memory_space<vmem>>, vector<1x8x48xf32>,
    %43 = vector.extract_strided_slice %0 {offsets = [0, 4], sizes = [8, 1], strides = [1, 1]} : vector<8x16xf32> to vector<8x1xf32>
    %44 = vector.broadcast %43 : vector<8x1xf32> to vector<8x48xf32>
    %45 = vector.broadcast %1 : vector<1x48xf32> to vector<8x48xf32>
    %46 = arith.mulf %44, %45 : vector<8x48xf32>
    %47 = vector.broadcast %2 : vector<1x48xf32> to vector<8x48xf32>
    %48 = arith.addf %46, %47 : vector<8x48xf32>
    %c4 = arith.constant 4 : index
    %c0_21 = arith.constant 0 : index
    %c0_22 = arith.constant 0 : index
    %49 = vector.load %arg5[%c4, %c0_21, %c0_22] : memref<16x8x48xf32, #tpu.memory_space<vmem>>, vector<1x8x48xf32>
    %50 = vector.shape_cast %49 : vector<1x8x48xf32> to vector<8x48xf32>
    %51 = vector.shape_cast %48 : vector<8x48xf32> to vector<1x8x48xf32>
    tpu.vector_store %arg5[%c4, %c0_21, %c0_22], %51 {strides = array<i32>} : memref<16x8x48xf32, #tpu.memory_space<vmem>>, vector<1x8x48xf32>,
    %52 = vector.extract_strided_slice %0 {offsets = [0, 5], sizes = [8, 1], strides = [1, 1]} : vector<8x16xf32> to vector<8x1xf32>
    %53 = vector.broadcast %52 : vector<8x1xf32> to vector<8x48xf32>
    %54 = vector.broadcast %1 : vector<1x48xf32> to vector<8x48xf32>
    %55 = arith.mulf %53, %54 : vector<8x48xf32>
    %56 = vector.broadcast %2 : vector<1x48xf32> to vector<8x48xf32>
    %57 = arith.addf %55, %56 : vector<8x48xf32>
    %c5 = arith.constant 5 : index
    %c0_23 = arith.constant 0 : index
    %c0_24 = arith.constant 0 : index
    %58 = vector.load %arg5[%c5, %c0_23, %c0_24] : memref<16x8x48xf32, #tpu.memory_space<vmem>>, vector<1x8x48xf32>
    %59 = vector.shape_cast %58 : vector<1x8x48xf32> to vector<8x48xf32>
    %60 = vector.shape_cast %57 : vector<8x48xf32> to vector<1x8x48xf32>
    tpu.vector_store %arg5[%c5, %c0_23, %c0_24], %60 {strides = array<i32>} : memref<16x8x48xf32, #tpu.memory_space<vmem>>, vector<1x8x48xf32>,
    %61 = vector.extract_strided_slice %0 {offsets = [0, 6], sizes = [8, 1], strides = [1, 1]} : vector<8x16xf32> to vector<8x1xf32>
    %62 = vector.broadcast %61 : vector<8x1xf32> to vector<8x48xf32>
    %63 = vector.broadcast %1 : vector<1x48xf32> to vector<8x48xf32>
    %64 = arith.mulf %62, %63 : vector<8x48xf32>
    %65 = vector.broadcast %2 : vector<1x48xf32> to vector<8x48xf32>
    %66 = arith.addf %64, %65 : vector<8x48xf32>
    %c6 = arith.constant 6 : index
    %c0_25 = arith.constant 0 : index
    %c0_26 = arith.constant 0 : index
    %67 = vector.load %arg5[%c6, %c0_25, %c0_26] : memref<16x8x48xf32, #tpu.memory_space<vmem>>, vector<1x8x48xf32>
    %68 = vector.shape_cast %67 : vector<1x8x48xf32> to vector<8x48xf32>
    %69 = vector.shape_cast %66 : vector<8x48xf32> to vector<1x8x48xf32>
    tpu.vector_store %arg5[%c6, %c0_25, %c0_26], %69 {strides = array<i32>} : memref<16x8x48xf32, #tpu.memory_space<vmem>>, vector<1x8x48xf32>,
    %70 = vector.extract_strided_slice %0 {offsets = [0, 7], sizes = [8, 1], strides = [1, 1]} : vector<8x16xf32> to vector<8x1xf32>
    %71 = vector.broadcast %70 : vector<8x1xf32> to vector<8x48xf32>
    %72 = vector.broadcast %1 : vector<1x48xf32> to vector<8x48xf32>
    %73 = arith.mulf %71, %72 : vector<8x48xf32>
    %74 = vector.broadcast %2 : vector<1x48xf32> to vector<8x48xf32>
    %75 = arith.addf %73, %74 : vector<8x48xf32>
    %c7 = arith.constant 7 : index
    %c0_27 = arith.constant 0 : index
    %c0_28 = arith.constant 0 : index
    %76 = vector.load %arg5[%c7, %c0_27, %c0_28] : memref<16x8x48xf32, #tpu.memory_space<vmem>>, vector<1x8x48xf32>
    %77 = vector.shape_cast %76 : vector<1x8x48xf32> to vector<8x48xf32>
    %78 = vector.shape_cast %75 : vector<8x48xf32> to vector<1x8x48xf32>
    tpu.vector_store %arg5[%c7, %c0_27, %c0_28], %78 {strides = array<i32>} : memref<16x8x48xf32, #tpu.memory_space<vmem>>, vector<1x8x48xf32>,
    %79 = vector.extract_strided_slice %0 {offsets = [0, 8], sizes = [8, 1], strides = [1, 1]} : vector<8x16xf32> to vector<8x1xf32>
    %80 = vector.broadcast %79 : vector<8x1xf32> to vector<8x48xf32>
    %81 = vector.broadcast %1 : vector<1x48xf32> to vector<8x48xf32>
    %82 = arith.mulf %80, %81 : vector<8x48xf32>
    %83 = vector.broadcast %2 : vector<1x48xf32> to vector<8x48xf32>
    %84 = arith.addf %82, %83 : vector<8x48xf32>
    %c8 = arith.constant 8 : index
    %c0_29 = arith.constant 0 : index
    %c0_30 = arith.constant 0 : index
    %85 = vector.load %arg5[%c8, %c0_29, %c0_30] : memref<16x8x48xf32, #tpu.memory_space<vmem>>, vector<1x8x48xf32>
    %86 = vector.shape_cast %85 : vector<1x8x48xf32> to vector<8x48xf32>
    %87 = vector.shape_cast %84 : vector<8x48xf32> to vector<1x8x48xf32>
    tpu.vector_store %arg5[%c8, %c0_29, %c0_30], %87 {strides = array<i32>} : memref<16x8x48xf32, #tpu.memory_space<vmem>>, vector<1x8x48xf32>,
    %88 = vector.extract_strided_slice %0 {offsets = [0, 9], sizes = [8, 1], strides = [1, 1]} : vector<8x16xf32> to vector<8x1xf32>
    %89 = vector.broadcast %88 : vector<8x1xf32> to vector<8x48xf32>
    %90 = vector.broadcast %1 : vector<1x48xf32> to vector<8x48xf32>
    %91 = arith.mulf %89, %90 : vector<8x48xf32>
    %92 = vector.broadcast %2 : vector<1x48xf32> to vector<8x48xf32>
    %93 = arith.addf %91, %92 : vector<8x48xf32>
    %c9 = arith.constant 9 : index
    %c0_31 = arith.constant 0 : index
    %c0_32 = arith.constant 0 : index
    %94 = vector.load %arg5[%c9, %c0_31, %c0_32] : memref<16x8x48xf32, #tpu.memory_space<vmem>>, vector<1x8x48xf32>
    %95 = vector.shape_cast %94 : vector<1x8x48xf32> to vector<8x48xf32>
    %96 = vector.shape_cast %93 : vector<8x48xf32> to vector<1x8x48xf32>
    tpu.vector_store %arg5[%c9, %c0_31, %c0_32], %96 {strides = array<i32>} : memref<16x8x48xf32, #tpu.memory_space<vmem>>, vector<1x8x48xf32>,
    %97 = vector.extract_strided_slice %0 {offsets = [0, 10], sizes = [8, 1], strides = [1, 1]} : vector<8x16xf32> to vector<8x1xf32>
    %98 = vector.broadcast %97 : vector<8x1xf32> to vector<8x48xf32>
    %99 = vector.broadcast %1 : vector<1x48xf32> to vector<8x48xf32>
    %100 = arith.mulf %98, %99 : vector<8x48xf32>
    %101 = vector.broadcast %2 : vector<1x48xf32> to vector<8x48xf32>
    %102 = arith.addf %100, %101 : vector<8x48xf32>
    %c10 = arith.constant 10 : index
    %c0_33 = arith.constant 0 : index
    %c0_34 = arith.constant 0 : index
    %103 = vector.load %arg5[%c10, %c0_33, %c0_34] : memref<16x8x48xf32, #tpu.memory_space<vmem>>, vector<1x8x48xf32>
    %104 = vector.shape_cast %103 : vector<1x8x48xf32> to vector<8x48xf32>
    %105 = vector.shape_cast %102 : vector<8x48xf32> to vector<1x8x48xf32>
    tpu.vector_store %arg5[%c10, %c0_33, %c0_34], %105 {strides = array<i32>} : memref<16x8x48xf32, #tpu.memory_space<vmem>>, vector<1x8x48xf32>,
    %106 = vector.extract_strided_slice %0 {offsets = [0, 11], sizes = [8, 1], strides = [1, 1]} : vector<8x16xf32> to vector<8x1xf32>
    %107 = vector.broadcast %106 : vector<8x1xf32> to vector<8x48xf32>
    %108 = vector.broadcast %1 : vector<1x48xf32> to vector<8x48xf32>
    %109 = arith.mulf %107, %108 : vector<8x48xf32>
    %110 = vector.broadcast %2 : vector<1x48xf32> to vector<8x48xf32>
    %111 = arith.addf %109, %110 : vector<8x48xf32>
    %c11 = arith.constant 11 : index
    %c0_35 = arith.constant 0 : index
    %c0_36 = arith.constant 0 : index
    %112 = vector.load %arg5[%c11, %c0_35, %c0_36] : memref<16x8x48xf32, #tpu.memory_space<vmem>>, vector<1x8x48xf32>
    %113 = vector.shape_cast %112 : vector<1x8x48xf32> to vector<8x48xf32>
    %114 = vector.shape_cast %111 : vector<8x48xf32> to vector<1x8x48xf32>
    tpu.vector_store %arg5[%c11, %c0_35, %c0_36], %114 {strides = array<i32>} : memref<16x8x48xf32, #tpu.memory_space<vmem>>, vector<1x8x48xf32>,
    %115 = vector.extract_strided_slice %0 {offsets = [0, 12], sizes = [8, 1], strides = [1, 1]} : vector<8x16xf32> to vector<8x1xf32>
    %116 = vector.broadcast %115 : vector<8x1xf32> to vector<8x48xf32>
    %117 = vector.broadcast %1 : vector<1x48xf32> to vector<8x48xf32>
    %118 = arith.mulf %116, %117 : vector<8x48xf32>
    %119 = vector.broadcast %2 : vector<1x48xf32> to vector<8x48xf32>
    %120 = arith.addf %118, %119 : vector<8x48xf32>
    %c12 = arith.constant 12 : index
    %c0_37 = arith.constant 0 : index
    %c0_38 = arith.constant 0 : index
    %121 = vector.load %arg5[%c12, %c0_37, %c0_38] : memref<16x8x48xf32, #tpu.memory_space<vmem>>, vector<1x8x48xf32>
    %122 = vector.shape_cast %121 : vector<1x8x48xf32> to vector<8x48xf32>
    %123 = vector.shape_cast %120 : vector<8x48xf32> to vector<1x8x48xf32>
    tpu.vector_store %arg5[%c12, %c0_37, %c0_38], %123 {strides = array<i32>} : memref<16x8x48xf32, #tpu.memory_space<vmem>>, vector<1x8x48xf32>,
    %124 = vector.extract_strided_slice %0 {offsets = [0, 13], sizes = [8, 1], strides = [1, 1]} : vector<8x16xf32> to vector<8x1xf32>
    %125 = vector.broadcast %124 : vector<8x1xf32> to vector<8x48xf32>
    %126 = vector.broadcast %1 : vector<1x48xf32> to vector<8x48xf32>
    %127 = arith.mulf %125, %126 : vector<8x48xf32>
    %128 = vector.broadcast %2 : vector<1x48xf32> to vector<8x48xf32>
    %129 = arith.addf %127, %128 : vector<8x48xf32>
    %c13 = arith.constant 13 : index
    %c0_39 = arith.constant 0 : index
    %c0_40 = arith.constant 0 : index
    %130 = vector.load %arg5[%c13, %c0_39, %c0_40] : memref<16x8x48xf32, #tpu.memory_space<vmem>>, vector<1x8x48xf32>
    %131 = vector.shape_cast %130 : vector<1x8x48xf32> to vector<8x48xf32>
    %132 = vector.shape_cast %129 : vector<8x48xf32> to vector<1x8x48xf32>
    tpu.vector_store %arg5[%c13, %c0_39, %c0_40], %132 {strides = array<i32>} : memref<16x8x48xf32, #tpu.memory_space<vmem>>, vector<1x8x48xf32>,
    %133 = vector.extract_strided_slice %0 {offsets = [0, 14], sizes = [8, 1], strides = [1, 1]} : vector<8x16xf32> to vector<8x1xf32>
    %134 = vector.broadcast %133 : vector<8x1xf32> to vector<8x48xf32>
    %135 = vector.broadcast %1 : vector<1x48xf32> to vector<8x48xf32>
    %136 = arith.mulf %134, %135 : vector<8x48xf32>
    %137 = vector.broadcast %2 : vector<1x48xf32> to vector<8x48xf32>
    %138 = arith.addf %136, %137 : vector<8x48xf32>
    %c14 = arith.constant 14 : index
    %c0_41 = arith.constant 0 : index
    %c0_42 = arith.constant 0 : index
    %139 = vector.load %arg5[%c14, %c0_41, %c0_42] : memref<16x8x48xf32, #tpu.memory_space<vmem>>, vector<1x8x48xf32>
    %140 = vector.shape_cast %139 : vector<1x8x48xf32> to vector<8x48xf32>
    %141 = vector.shape_cast %138 : vector<8x48xf32> to vector<1x8x48xf32>
    tpu.vector_store %arg5[%c14, %c0_41, %c0_42], %141 {strides = array<i32>} : memref<16x8x48xf32, #tpu.memory_space<vmem>>, vector<1x8x48xf32>,
    %142 = vector.extract_strided_slice %0 {offsets = [0, 15], sizes = [8, 1], strides = [1, 1]} : vector<8x16xf32> to vector<8x1xf32>
    %143 = vector.broadcast %142 : vector<8x1xf32> to vector<8x48xf32>
    %144 = vector.broadcast %1 : vector<1x48xf32> to vector<8x48xf32>
    %145 = arith.mulf %143, %144 : vector<8x48xf32>
    %146 = vector.broadcast %2 : vector<1x48xf32> to vector<8x48xf32>
    %147 = arith.addf %145, %146 : vector<8x48xf32>
    %c15 = arith.constant 15 : index
    %c0_43 = arith.constant 0 : index
    %c0_44 = arith.constant 0 : index
    %148 = vector.load %arg5[%c15, %c0_43, %c0_44] : memref<16x8x48xf32, #tpu.memory_space<vmem>>, vector<1x8x48xf32>
    %149 = vector.shape_cast %148 : vector<1x8x48xf32> to vector<8x48xf32>
    %150 = vector.shape_cast %147 : vector<8x48xf32> to vector<1x8x48xf32>
    tpu.vector_store %arg5[%c15, %c0_43, %c0_44], %150 {strides = array<i32>} : memref<16x8x48xf32, #tpu.memory_space<vmem>>, vector<1x8x48xf32>,
    %151 = vector.shape_cast %3 : vector<1x48xf32> to vector<1x48xf32>
    %152 = vector.broadcast %151 : vector<1x48xf32> to vector<8x48xf32>
    %cst = arith.constant 0.000000e+00 : f32
    %153 = vector.broadcast %cst : f32 to vector<8x16xf32>
    %c0_45 = arith.constant 0 : index
    %c0_46 = arith.constant 0 : index
    %c0_47 = arith.constant 0 : index
    %154 = vector.load %arg5[%c0_45, %c0_46, %c0_47] : memref<16x8x48xf32, #tpu.memory_space<vmem>>, vector<1x8x48xf32>
    %155 = vector.shape_cast %154 : vector<1x8x48xf32> to vector<8x48xf32>
    %cst_48 = arith.constant dense<0.000000e+00> : vector<8x48xf32>
    %156 = tpu.matmul %153, %5, %cst_48 {dimension_numbers = #tpu.dot_dimension_numbers<[1], [0], [0], [1], [0, 0, 1, 1], [], []>} : vector<8x16xf32>, vector<16x48xf32>, vector<8x48xf32> -> vector<8x48xf32>
    %157 = arith.addf %156, %152 : vector<8x48xf32>
    %158 = vector.extract_strided_slice %155 {offsets = [0, 0], sizes = [8, 32], strides = [1, 1]} : vector<8x48xf32> to vector<8x32xf32>
    %159 = vector.extract_strided_slice %157 {offsets = [0, 0], sizes = [8, 32], strides = [1, 1]} : vector<8x48xf32> to vector<8x32xf32>
    %160 = arith.addf %158, %159 : vector<8x32xf32>
    %161 = arith.negf %160 : vector<8x32xf32>
    %162 = math.exp %161 : vector<8x32xf32>
    %cst_49 = arith.constant 1.000000e+00 : f32
    %163 = vector.broadcast %cst_49 : f32 to vector<8x32xf32>
    %164 = arith.addf %163, %162 : vector<8x32xf32>
    %165 = arith.divf %163, %164 : vector<8x32xf32>
    %166 = vector.extract_strided_slice %165 {offsets = [0, 0], sizes = [8, 16], strides = [1, 1]} : vector<8x32xf32> to vector<8x16xf32>
    %167 = vector.extract_strided_slice %165 {offsets = [0, 16], sizes = [8, 16], strides = [1, 1]} : vector<8x32xf32> to vector<8x16xf32>
    %168 = vector.extract_strided_slice %155 {offsets = [0, 32], sizes = [8, 16], strides = [1, 1]} : vector<8x48xf32> to vector<8x16xf32>
    %169 = vector.extract_strided_slice %157 {offsets = [0, 32], sizes = [8, 16], strides = [1, 1]} : vector<8x48xf32> to vector<8x16xf32>
    %170 = arith.mulf %166, %169 : vector<8x16xf32>
    %171 = arith.addf %168, %170 : vector<8x16xf32>
    %172 = math.tanh %171 : vector<8x16xf32>
    %cst_50 = arith.constant 1.000000e+00 : f32
    %173 = vector.broadcast %cst_50 : f32 to vector<8x16xf32>
    %174 = arith.subf %173, %167 : vector<8x16xf32>
    %175 = arith.mulf %174, %172 : vector<8x16xf32>
    %176 = arith.mulf %167, %153 : vector<8x16xf32>
    %177 = arith.addf %175, %176 : vector<8x16xf32>
    %c1_51 = arith.constant 1 : index
    %c0_52 = arith.constant 0 : index
    %c0_53 = arith.constant 0 : index
    %178 = vector.load %arg5[%c1_51, %c0_52, %c0_53] : memref<16x8x48xf32, #tpu.memory_space<vmem>>, vector<1x8x48xf32>
    %179 = vector.shape_cast %178 : vector<1x8x48xf32> to vector<8x48xf32>
    %cst_54 = arith.constant dense<0.000000e+00> : vector<8x48xf32>
    %180 = tpu.matmul %177, %5, %cst_54 {dimension_numbers = #tpu.dot_dimension_numbers<[1], [0], [0], [1], [0, 0, 1, 1], [], []>} : vector<8x16xf32>, vector<16x48xf32>, vector<8x48xf32> -> vector<8x48xf32>
    %181 = arith.addf %180, %152 : vector<8x48xf32>
    %182 = vector.extract_strided_slice %179 {offsets = [0, 0], sizes = [8, 32], strides = [1, 1]} : vector<8x48xf32> to vector<8x32xf32>
    %183 = vector.extract_strided_slice %181 {offsets = [0, 0], sizes = [8, 32], strides = [1, 1]} : vector<8x48xf32> to vector<8x32xf32>
    %184 = arith.addf %182, %183 : vector<8x32xf32>
    %185 = arith.negf %184 : vector<8x32xf32>
    %186 = math.exp %185 : vector<8x32xf32>
    %cst_55 = arith.constant 1.000000e+00 : f32
    %187 = vector.broadcast %cst_55 : f32 to vector<8x32xf32>
    %188 = arith.addf %187, %186 : vector<8x32xf32>
    %189 = arith.divf %187, %188 : vector<8x32xf32>
    %190 = vector.extract_strided_slice %189 {offsets = [0, 0], sizes = [8, 16], strides = [1, 1]} : vector<8x32xf32> to vector<8x16xf32>
    %191 = vector.extract_strided_slice %189 {offsets = [0, 16], sizes = [8, 16], strides = [1, 1]} : vector<8x32xf32> to vector<8x16xf32>
    %192 = vector.extract_strided_slice %179 {offsets = [0, 32], sizes = [8, 16], strides = [1, 1]} : vector<8x48xf32> to vector<8x16xf32>
    %193 = vector.extract_strided_slice %181 {offsets = [0, 32], sizes = [8, 16], strides = [1, 1]} : vector<8x48xf32> to vector<8x16xf32>
    %194 = arith.mulf %190, %193 : vector<8x16xf32>
    %195 = arith.addf %192, %194 : vector<8x16xf32>
    %196 = math.tanh %195 : vector<8x16xf32>
    %cst_56 = arith.constant 1.000000e+00 : f32
    %197 = vector.broadcast %cst_56 : f32 to vector<8x16xf32>
    %198 = arith.subf %197, %191 : vector<8x16xf32>
    %199 = arith.mulf %198, %196 : vector<8x16xf32>
    %200 = arith.mulf %191, %177 : vector<8x16xf32>
    %201 = arith.addf %199, %200 : vector<8x16xf32>
    %c2_57 = arith.constant 2 : index
    %c0_58 = arith.constant 0 : index
    %c0_59 = arith.constant 0 : index
    %202 = vector.load %arg5[%c2_57, %c0_58, %c0_59] : memref<16x8x48xf32, #tpu.memory_space<vmem>>, vector<1x8x48xf32>
    %203 = vector.shape_cast %202 : vector<1x8x48xf32> to vector<8x48xf32>
    %cst_60 = arith.constant dense<0.000000e+00> : vector<8x48xf32>
    %204 = tpu.matmul %201, %5, %cst_60 {dimension_numbers = #tpu.dot_dimension_numbers<[1], [0], [0], [1], [0, 0, 1, 1], [], []>} : vector<8x16xf32>, vector<16x48xf32>, vector<8x48xf32> -> vector<8x48xf32>
    %205 = arith.addf %204, %152 : vector<8x48xf32>
    %206 = vector.extract_strided_slice %203 {offsets = [0, 0], sizes = [8, 32], strides = [1, 1]} : vector<8x48xf32> to vector<8x32xf32>
    %207 = vector.extract_strided_slice %205 {offsets = [0, 0], sizes = [8, 32], strides = [1, 1]} : vector<8x48xf32> to vector<8x32xf32>
    %208 = arith.addf %206, %207 : vector<8x32xf32>
    %209 = arith.negf %208 : vector<8x32xf32>
    %210 = math.exp %209 : vector<8x32xf32>
    %cst_61 = arith.constant 1.000000e+00 : f32
    %211 = vector.broadcast %cst_61 : f32 to vector<8x32xf32>
    %212 = arith.addf %211, %210 : vector<8x32xf32>
    %213 = arith.divf %211, %212 : vector<8x32xf32>
    %214 = vector.extract_strided_slice %213 {offsets = [0, 0], sizes = [8, 16], strides = [1, 1]} : vector<8x32xf32> to vector<8x16xf32>
    %215 = vector.extract_strided_slice %213 {offsets = [0, 16], sizes = [8, 16], strides = [1, 1]} : vector<8x32xf32> to vector<8x16xf32>
    %216 = vector.extract_strided_slice %203 {offsets = [0, 32], sizes = [8, 16], strides = [1, 1]} : vector<8x48xf32> to vector<8x16xf32>
    %217 = vector.extract_strided_slice %205 {offsets = [0, 32], sizes = [8, 16], strides = [1, 1]} : vector<8x48xf32> to vector<8x16xf32>
    %218 = arith.mulf %214, %217 : vector<8x16xf32>
    %219 = arith.addf %216, %218 : vector<8x16xf32>
    %220 = math.tanh %219 : vector<8x16xf32>
    %cst_62 = arith.constant 1.000000e+00 : f32
    %221 = vector.broadcast %cst_62 : f32 to vector<8x16xf32>
    %222 = arith.subf %221, %215 : vector<8x16xf32>
    %223 = arith.mulf %222, %220 : vector<8x16xf32>
    %224 = arith.mulf %215, %201 : vector<8x16xf32>
    %225 = arith.addf %223, %224 : vector<8x16xf32>
    %c3_63 = arith.constant 3 : index
    %c0_64 = arith.constant 0 : index
    %c0_65 = arith.constant 0 : index
    %226 = vector.load %arg5[%c3_63, %c0_64, %c0_65] : memref<16x8x48xf32, #tpu.memory_space<vmem>>, vector<1x8x48xf32>
    %227 = vector.shape_cast %226 : vector<1x8x48xf32> to vector<8x48xf32>
    %cst_66 = arith.constant dense<0.000000e+00> : vector<8x48xf32>
    %228 = tpu.matmul %225, %5, %cst_66 {dimension_numbers = #tpu.dot_dimension_numbers<[1], [0], [0], [1], [0, 0, 1, 1], [], []>} : vector<8x16xf32>, vector<16x48xf32>, vector<8x48xf32> -> vector<8x48xf32>
    %229 = arith.addf %228, %152 : vector<8x48xf32>
    %230 = vector.extract_strided_slice %227 {offsets = [0, 0], sizes = [8, 32], strides = [1, 1]} : vector<8x48xf32> to vector<8x32xf32>
    %231 = vector.extract_strided_slice %229 {offsets = [0, 0], sizes = [8, 32], strides = [1, 1]} : vector<8x48xf32> to vector<8x32xf32>
    %232 = arith.addf %230, %231 : vector<8x32xf32>
    %233 = arith.negf %232 : vector<8x32xf32>
    %234 = math.exp %233 : vector<8x32xf32>
    %cst_67 = arith.constant 1.000000e+00 : f32
    %235 = vector.broadcast %cst_67 : f32 to vector<8x32xf32>
    %236 = arith.addf %235, %234 : vector<8x32xf32>
    %237 = arith.divf %235, %236 : vector<8x32xf32>
    %238 = vector.extract_strided_slice %237 {offsets = [0, 0], sizes = [8, 16], strides = [1, 1]} : vector<8x32xf32> to vector<8x16xf32>
    %239 = vector.extract_strided_slice %237 {offsets = [0, 16], sizes = [8, 16], strides = [1, 1]} : vector<8x32xf32> to vector<8x16xf32>
    %240 = vector.extract_strided_slice %227 {offsets = [0, 32], sizes = [8, 16], strides = [1, 1]} : vector<8x48xf32> to vector<8x16xf32>
    %241 = vector.extract_strided_slice %229 {offsets = [0, 32], sizes = [8, 16], strides = [1, 1]} : vector<8x48xf32> to vector<8x16xf32>
    %242 = arith.mulf %238, %241 : vector<8x16xf32>
    %243 = arith.addf %240, %242 : vector<8x16xf32>
    %244 = math.tanh %243 : vector<8x16xf32>
    %cst_68 = arith.constant 1.000000e+00 : f32
    %245 = vector.broadcast %cst_68 : f32 to vector<8x16xf32>
    %246 = arith.subf %245, %239 : vector<8x16xf32>
    %247 = arith.mulf %246, %244 : vector<8x16xf32>
    %248 = arith.mulf %239, %225 : vector<8x16xf32>
    %249 = arith.addf %247, %248 : vector<8x16xf32>
    %c4_69 = arith.constant 4 : index
    %c0_70 = arith.constant 0 : index
    %c0_71 = arith.constant 0 : index
    %250 = vector.load %arg5[%c4_69, %c0_70, %c0_71] : memref<16x8x48xf32, #tpu.memory_space<vmem>>, vector<1x8x48xf32>
    %251 = vector.shape_cast %250 : vector<1x8x48xf32> to vector<8x48xf32>
    %cst_72 = arith.constant dense<0.000000e+00> : vector<8x48xf32>
    %252 = tpu.matmul %249, %5, %cst_72 {dimension_numbers = #tpu.dot_dimension_numbers<[1], [0], [0], [1], [0, 0, 1, 1], [], []>} : vector<8x16xf32>, vector<16x48xf32>, vector<8x48xf32> -> vector<8x48xf32>
    %253 = arith.addf %252, %152 : vector<8x48xf32>
    %254 = vector.extract_strided_slice %251 {offsets = [0, 0], sizes = [8, 32], strides = [1, 1]} : vector<8x48xf32> to vector<8x32xf32>
    %255 = vector.extract_strided_slice %253 {offsets = [0, 0], sizes = [8, 32], strides = [1, 1]} : vector<8x48xf32> to vector<8x32xf32>
    %256 = arith.addf %254, %255 : vector<8x32xf32>
    %257 = arith.negf %256 : vector<8x32xf32>
    %258 = math.exp %257 : vector<8x32xf32>
    %cst_73 = arith.constant 1.000000e+00 : f32
    %259 = vector.broadcast %cst_73 : f32 to vector<8x32xf32>
    %260 = arith.addf %259, %258 : vector<8x32xf32>
    %261 = arith.divf %259, %260 : vector<8x32xf32>
    %262 = vector.extract_strided_slice %261 {offsets = [0, 0], sizes = [8, 16], strides = [1, 1]} : vector<8x32xf32> to vector<8x16xf32>
    %263 = vector.extract_strided_slice %261 {offsets = [0, 16], sizes = [8, 16], strides = [1, 1]} : vector<8x32xf32> to vector<8x16xf32>
    %264 = vector.extract_strided_slice %251 {offsets = [0, 32], sizes = [8, 16], strides = [1, 1]} : vector<8x48xf32> to vector<8x16xf32>
    %265 = vector.extract_strided_slice %253 {offsets = [0, 32], sizes = [8, 16], strides = [1, 1]} : vector<8x48xf32> to vector<8x16xf32>
    %266 = arith.mulf %262, %265 : vector<8x16xf32>
    %267 = arith.addf %264, %266 : vector<8x16xf32>
    %268 = math.tanh %267 : vector<8x16xf32>
    %cst_74 = arith.constant 1.000000e+00 : f32
    %269 = vector.broadcast %cst_74 : f32 to vector<8x16xf32>
    %270 = arith.subf %269, %263 : vector<8x16xf32>
    %271 = arith.mulf %270, %268 : vector<8x16xf32>
    %272 = arith.mulf %263, %249 : vector<8x16xf32>
    %273 = arith.addf %271, %272 : vector<8x16xf32>
    %c5_75 = arith.constant 5 : index
    %c0_76 = arith.constant 0 : index
    %c0_77 = arith.constant 0 : index
    %274 = vector.load %arg5[%c5_75, %c0_76, %c0_77] : memref<16x8x48xf32, #tpu.memory_space<vmem>>, vector<1x8x48xf32>
    %275 = vector.shape_cast %274 : vector<1x8x48xf32> to vector<8x48xf32>
    %cst_78 = arith.constant dense<0.000000e+00> : vector<8x48xf32>
    %276 = tpu.matmul %273, %5, %cst_78 {dimension_numbers = #tpu.dot_dimension_numbers<[1], [0], [0], [1], [0, 0, 1, 1], [], []>} : vector<8x16xf32>, vector<16x48xf32>, vector<8x48xf32> -> vector<8x48xf32>
    %277 = arith.addf %276, %152 : vector<8x48xf32>
    %278 = vector.extract_strided_slice %275 {offsets = [0, 0], sizes = [8, 32], strides = [1, 1]} : vector<8x48xf32> to vector<8x32xf32>
    %279 = vector.extract_strided_slice %277 {offsets = [0, 0], sizes = [8, 32], strides = [1, 1]} : vector<8x48xf32> to vector<8x32xf32>
    %280 = arith.addf %278, %279 : vector<8x32xf32>
    %281 = arith.negf %280 : vector<8x32xf32>
    %282 = math.exp %281 : vector<8x32xf32>
    %cst_79 = arith.constant 1.000000e+00 : f32
    %283 = vector.broadcast %cst_79 : f32 to vector<8x32xf32>
    %284 = arith.addf %283, %282 : vector<8x32xf32>
    %285 = arith.divf %283, %284 : vector<8x32xf32>
    %286 = vector.extract_strided_slice %285 {offsets = [0, 0], sizes = [8, 16], strides = [1, 1]} : vector<8x32xf32> to vector<8x16xf32>
    %287 = vector.extract_strided_slice %285 {offsets = [0, 16], sizes = [8, 16], strides = [1, 1]} : vector<8x32xf32> to vector<8x16xf32>
    %288 = vector.extract_strided_slice %275 {offsets = [0, 32], sizes = [8, 16], strides = [1, 1]} : vector<8x48xf32> to vector<8x16xf32>
    %289 = vector.extract_strided_slice %277 {offsets = [0, 32], sizes = [8, 16], strides = [1, 1]} : vector<8x48xf32> to vector<8x16xf32>
    %290 = arith.mulf %286, %289 : vector<8x16xf32>
    %291 = arith.addf %288, %290 : vector<8x16xf32>
    %292 = math.tanh %291 : vector<8x16xf32>
    %cst_80 = arith.constant 1.000000e+00 : f32
    %293 = vector.broadcast %cst_80 : f32 to vector<8x16xf32>
    %294 = arith.subf %293, %287 : vector<8x16xf32>
    %295 = arith.mulf %294, %292 : vector<8x16xf32>
    %296 = arith.mulf %287, %273 : vector<8x16xf32>
    %297 = arith.addf %295, %296 : vector<8x16xf32>
    %c6_81 = arith.constant 6 : index
    %c0_82 = arith.constant 0 : index
    %c0_83 = arith.constant 0 : index
    %298 = vector.load %arg5[%c6_81, %c0_82, %c0_83] : memref<16x8x48xf32, #tpu.memory_space<vmem>>, vector<1x8x48xf32>
    %299 = vector.shape_cast %298 : vector<1x8x48xf32> to vector<8x48xf32>
    %cst_84 = arith.constant dense<0.000000e+00> : vector<8x48xf32>
    %300 = tpu.matmul %297, %5, %cst_84 {dimension_numbers = #tpu.dot_dimension_numbers<[1], [0], [0], [1], [0, 0, 1, 1], [], []>} : vector<8x16xf32>, vector<16x48xf32>, vector<8x48xf32> -> vector<8x48xf32>
    %301 = arith.addf %300, %152 : vector<8x48xf32>
    %302 = vector.extract_strided_slice %299 {offsets = [0, 0], sizes = [8, 32], strides = [1, 1]} : vector<8x48xf32> to vector<8x32xf32>
    %303 = vector.extract_strided_slice %301 {offsets = [0, 0], sizes = [8, 32], strides = [1, 1]} : vector<8x48xf32> to vector<8x32xf32>
    %304 = arith.addf %302, %303 : vector<8x32xf32>
    %305 = arith.negf %304 : vector<8x32xf32>
    %306 = math.exp %305 : vector<8x32xf32>
    %cst_85 = arith.constant 1.000000e+00 : f32
    %307 = vector.broadcast %cst_85 : f32 to vector<8x32xf32>
    %308 = arith.addf %307, %306 : vector<8x32xf32>
    %309 = arith.divf %307, %308 : vector<8x32xf32>
    %310 = vector.extract_strided_slice %309 {offsets = [0, 0], sizes = [8, 16], strides = [1, 1]} : vector<8x32xf32> to vector<8x16xf32>
    %311 = vector.extract_strided_slice %309 {offsets = [0, 16], sizes = [8, 16], strides = [1, 1]} : vector<8x32xf32> to vector<8x16xf32>
    %312 = vector.extract_strided_slice %299 {offsets = [0, 32], sizes = [8, 16], strides = [1, 1]} : vector<8x48xf32> to vector<8x16xf32>
    %313 = vector.extract_strided_slice %301 {offsets = [0, 32], sizes = [8, 16], strides = [1, 1]} : vector<8x48xf32> to vector<8x16xf32>
    %314 = arith.mulf %310, %313 : vector<8x16xf32>
    %315 = arith.addf %312, %314 : vector<8x16xf32>
    %316 = math.tanh %315 : vector<8x16xf32>
    %cst_86 = arith.constant 1.000000e+00 : f32
    %317 = vector.broadcast %cst_86 : f32 to vector<8x16xf32>
    %318 = arith.subf %317, %311 : vector<8x16xf32>
    %319 = arith.mulf %318, %316 : vector<8x16xf32>
    %320 = arith.mulf %311, %297 : vector<8x16xf32>
    %321 = arith.addf %319, %320 : vector<8x16xf32>
    %c7_87 = arith.constant 7 : index
    %c0_88 = arith.constant 0 : index
    %c0_89 = arith.constant 0 : index
    %322 = vector.load %arg5[%c7_87, %c0_88, %c0_89] : memref<16x8x48xf32, #tpu.memory_space<vmem>>, vector<1x8x48xf32>
    %323 = vector.shape_cast %322 : vector<1x8x48xf32> to vector<8x48xf32>
    %cst_90 = arith.constant dense<0.000000e+00> : vector<8x48xf32>
    %324 = tpu.matmul %321, %5, %cst_90 {dimension_numbers = #tpu.dot_dimension_numbers<[1], [0], [0], [1], [0, 0, 1, 1], [], []>} : vector<8x16xf32>, vector<16x48xf32>, vector<8x48xf32> -> vector<8x48xf32>
    %325 = arith.addf %324, %152 : vector<8x48xf32>
    %326 = vector.extract_strided_slice %323 {offsets = [0, 0], sizes = [8, 32], strides = [1, 1]} : vector<8x48xf32> to vector<8x32xf32>
    %327 = vector.extract_strided_slice %325 {offsets = [0, 0], sizes = [8, 32], strides = [1, 1]} : vector<8x48xf32> to vector<8x32xf32>
    %328 = arith.addf %326, %327 : vector<8x32xf32>
    %329 = arith.negf %328 : vector<8x32xf32>
    %330 = math.exp %329 : vector<8x32xf32>
    %cst_91 = arith.constant 1.000000e+00 : f32
    %331 = vector.broadcast %cst_91 : f32 to vector<8x32xf32>
    %332 = arith.addf %331, %330 : vector<8x32xf32>
    %333 = arith.divf %331, %332 : vector<8x32xf32>
    %334 = vector.extract_strided_slice %333 {offsets = [0, 0], sizes = [8, 16], strides = [1, 1]} : vector<8x32xf32> to vector<8x16xf32>
    %335 = vector.extract_strided_slice %333 {offsets = [0, 16], sizes = [8, 16], strides = [1, 1]} : vector<8x32xf32> to vector<8x16xf32>
    %336 = vector.extract_strided_slice %323 {offsets = [0, 32], sizes = [8, 16], strides = [1, 1]} : vector<8x48xf32> to vector<8x16xf32>
    %337 = vector.extract_strided_slice %325 {offsets = [0, 32], sizes = [8, 16], strides = [1, 1]} : vector<8x48xf32> to vector<8x16xf32>
    %338 = arith.mulf %334, %337 : vector<8x16xf32>
    %339 = arith.addf %336, %338 : vector<8x16xf32>
    %340 = math.tanh %339 : vector<8x16xf32>
    %cst_92 = arith.constant 1.000000e+00 : f32
    %341 = vector.broadcast %cst_92 : f32 to vector<8x16xf32>
    %342 = arith.subf %341, %335 : vector<8x16xf32>
    %343 = arith.mulf %342, %340 : vector<8x16xf32>
    %344 = arith.mulf %335, %321 : vector<8x16xf32>
    %345 = arith.addf %343, %344 : vector<8x16xf32>
    %c8_93 = arith.constant 8 : index
    %c0_94 = arith.constant 0 : index
    %c0_95 = arith.constant 0 : index
    %346 = vector.load %arg5[%c8_93, %c0_94, %c0_95] : memref<16x8x48xf32, #tpu.memory_space<vmem>>, vector<1x8x48xf32>
    %347 = vector.shape_cast %346 : vector<1x8x48xf32> to vector<8x48xf32>
    %cst_96 = arith.constant dense<0.000000e+00> : vector<8x48xf32>
    %348 = tpu.matmul %345, %5, %cst_96 {dimension_numbers = #tpu.dot_dimension_numbers<[1], [0], [0], [1], [0, 0, 1, 1], [], []>} : vector<8x16xf32>, vector<16x48xf32>, vector<8x48xf32> -> vector<8x48xf32>
    %349 = arith.addf %348, %152 : vector<8x48xf32>
    %350 = vector.extract_strided_slice %347 {offsets = [0, 0], sizes = [8, 32], strides = [1, 1]} : vector<8x48xf32> to vector<8x32xf32>
    %351 = vector.extract_strided_slice %349 {offsets = [0, 0], sizes = [8, 32], strides = [1, 1]} : vector<8x48xf32> to vector<8x32xf32>
    %352 = arith.addf %350, %351 : vector<8x32xf32>
    %353 = arith.negf %352 : vector<8x32xf32>
    %354 = math.exp %353 : vector<8x32xf32>
    %cst_97 = arith.constant 1.000000e+00 : f32
    %355 = vector.broadcast %cst_97 : f32 to vector<8x32xf32>
    %356 = arith.addf %355, %354 : vector<8x32xf32>
    %357 = arith.divf %355, %356 : vector<8x32xf32>
    %358 = vector.extract_strided_slice %357 {offsets = [0, 0], sizes = [8, 16], strides = [1, 1]} : vector<8x32xf32> to vector<8x16xf32>
    %359 = vector.extract_strided_slice %357 {offsets = [0, 16], sizes = [8, 16], strides = [1, 1]} : vector<8x32xf32> to vector<8x16xf32>
    %360 = vector.extract_strided_slice %347 {offsets = [0, 32], sizes = [8, 16], strides = [1, 1]} : vector<8x48xf32> to vector<8x16xf32>
    %361 = vector.extract_strided_slice %349 {offsets = [0, 32], sizes = [8, 16], strides = [1, 1]} : vector<8x48xf32> to vector<8x16xf32>
    %362 = arith.mulf %358, %361 : vector<8x16xf32>
    %363 = arith.addf %360, %362 : vector<8x16xf32>
    %364 = math.tanh %363 : vector<8x16xf32>
    %cst_98 = arith.constant 1.000000e+00 : f32
    %365 = vector.broadcast %cst_98 : f32 to vector<8x16xf32>
    %366 = arith.subf %365, %359 : vector<8x16xf32>
    %367 = arith.mulf %366, %364 : vector<8x16xf32>
    %368 = arith.mulf %359, %345 : vector<8x16xf32>
    %369 = arith.addf %367, %368 : vector<8x16xf32>
    %c9_99 = arith.constant 9 : index
    %c0_100 = arith.constant 0 : index
    %c0_101 = arith.constant 0 : index
    %370 = vector.load %arg5[%c9_99, %c0_100, %c0_101] : memref<16x8x48xf32, #tpu.memory_space<vmem>>, vector<1x8x48xf32>
    %371 = vector.shape_cast %370 : vector<1x8x48xf32> to vector<8x48xf32>
    %cst_102 = arith.constant dense<0.000000e+00> : vector<8x48xf32>
    %372 = tpu.matmul %369, %5, %cst_102 {dimension_numbers = #tpu.dot_dimension_numbers<[1], [0], [0], [1], [0, 0, 1, 1], [], []>} : vector<8x16xf32>, vector<16x48xf32>, vector<8x48xf32> -> vector<8x48xf32>
    %373 = arith.addf %372, %152 : vector<8x48xf32>
    %374 = vector.extract_strided_slice %371 {offsets = [0, 0], sizes = [8, 32], strides = [1, 1]} : vector<8x48xf32> to vector<8x32xf32>
    %375 = vector.extract_strided_slice %373 {offsets = [0, 0], sizes = [8, 32], strides = [1, 1]} : vector<8x48xf32> to vector<8x32xf32>
    %376 = arith.addf %374, %375 : vector<8x32xf32>
    %377 = arith.negf %376 : vector<8x32xf32>
    %378 = math.exp %377 : vector<8x32xf32>
    %cst_103 = arith.constant 1.000000e+00 : f32
    %379 = vector.broadcast %cst_103 : f32 to vector<8x32xf32>
    %380 = arith.addf %379, %378 : vector<8x32xf32>
    %381 = arith.divf %379, %380 : vector<8x32xf32>
    %382 = vector.extract_strided_slice %381 {offsets = [0, 0], sizes = [8, 16], strides = [1, 1]} : vector<8x32xf32> to vector<8x16xf32>
    %383 = vector.extract_strided_slice %381 {offsets = [0, 16], sizes = [8, 16], strides = [1, 1]} : vector<8x32xf32> to vector<8x16xf32>
    %384 = vector.extract_strided_slice %371 {offsets = [0, 32], sizes = [8, 16], strides = [1, 1]} : vector<8x48xf32> to vector<8x16xf32>
    %385 = vector.extract_strided_slice %373 {offsets = [0, 32], sizes = [8, 16], strides = [1, 1]} : vector<8x48xf32> to vector<8x16xf32>
    %386 = arith.mulf %382, %385 : vector<8x16xf32>
    %387 = arith.addf %384, %386 : vector<8x16xf32>
    %388 = math.tanh %387 : vector<8x16xf32>
    %cst_104 = arith.constant 1.000000e+00 : f32
    %389 = vector.broadcast %cst_104 : f32 to vector<8x16xf32>
    %390 = arith.subf %389, %383 : vector<8x16xf32>
    %391 = arith.mulf %390, %388 : vector<8x16xf32>
    %392 = arith.mulf %383, %369 : vector<8x16xf32>
    %393 = arith.addf %391, %392 : vector<8x16xf32>
    %c10_105 = arith.constant 10 : index
    %c0_106 = arith.constant 0 : index
    %c0_107 = arith.constant 0 : index
    %394 = vector.load %arg5[%c10_105, %c0_106, %c0_107] : memref<16x8x48xf32, #tpu.memory_space<vmem>>, vector<1x8x48xf32>
    %395 = vector.shape_cast %394 : vector<1x8x48xf32> to vector<8x48xf32>
    %cst_108 = arith.constant dense<0.000000e+00> : vector<8x48xf32>
    %396 = tpu.matmul %393, %5, %cst_108 {dimension_numbers = #tpu.dot_dimension_numbers<[1], [0], [0], [1], [0, 0, 1, 1], [], []>} : vector<8x16xf32>, vector<16x48xf32>, vector<8x48xf32> -> vector<8x48xf32>
    %397 = arith.addf %396, %152 : vector<8x48xf32>
    %398 = vector.extract_strided_slice %395 {offsets = [0, 0], sizes = [8, 32], strides = [1, 1]} : vector<8x48xf32> to vector<8x32xf32>
    %399 = vector.extract_strided_slice %397 {offsets = [0, 0], sizes = [8, 32], strides = [1, 1]} : vector<8x48xf32> to vector<8x32xf32>
    %400 = arith.addf %398, %399 : vector<8x32xf32>
    %401 = arith.negf %400 : vector<8x32xf32>
    %402 = math.exp %401 : vector<8x32xf32>
    %cst_109 = arith.constant 1.000000e+00 : f32
    %403 = vector.broadcast %cst_109 : f32 to vector<8x32xf32>
    %404 = arith.addf %403, %402 : vector<8x32xf32>
    %405 = arith.divf %403, %404 : vector<8x32xf32>
    %406 = vector.extract_strided_slice %405 {offsets = [0, 0], sizes = [8, 16], strides = [1, 1]} : vector<8x32xf32> to vector<8x16xf32>
    %407 = vector.extract_strided_slice %405 {offsets = [0, 16], sizes = [8, 16], strides = [1, 1]} : vector<8x32xf32> to vector<8x16xf32>
    %408 = vector.extract_strided_slice %395 {offsets = [0, 32], sizes = [8, 16], strides = [1, 1]} : vector<8x48xf32> to vector<8x16xf32>
    %409 = vector.extract_strided_slice %397 {offsets = [0, 32], sizes = [8, 16], strides = [1, 1]} : vector<8x48xf32> to vector<8x16xf32>
    %410 = arith.mulf %406, %409 : vector<8x16xf32>
    %411 = arith.addf %408, %410 : vector<8x16xf32>
    %412 = math.tanh %411 : vector<8x16xf32>
    %cst_110 = arith.constant 1.000000e+00 : f32
    %413 = vector.broadcast %cst_110 : f32 to vector<8x16xf32>
    %414 = arith.subf %413, %407 : vector<8x16xf32>
    %415 = arith.mulf %414, %412 : vector<8x16xf32>
    %416 = arith.mulf %407, %393 : vector<8x16xf32>
    %417 = arith.addf %415, %416 : vector<8x16xf32>
    %c11_111 = arith.constant 11 : index
    %c0_112 = arith.constant 0 : index
    %c0_113 = arith.constant 0 : index
    %418 = vector.load %arg5[%c11_111, %c0_112, %c0_113] : memref<16x8x48xf32, #tpu.memory_space<vmem>>, vector<1x8x48xf32>
    %419 = vector.shape_cast %418 : vector<1x8x48xf32> to vector<8x48xf32>
    %cst_114 = arith.constant dense<0.000000e+00> : vector<8x48xf32>
    %420 = tpu.matmul %417, %5, %cst_114 {dimension_numbers = #tpu.dot_dimension_numbers<[1], [0], [0], [1], [0, 0, 1, 1], [], []>} : vector<8x16xf32>, vector<16x48xf32>, vector<8x48xf32> -> vector<8x48xf32>
    %421 = arith.addf %420, %152 : vector<8x48xf32>
    %422 = vector.extract_strided_slice %419 {offsets = [0, 0], sizes = [8, 32], strides = [1, 1]} : vector<8x48xf32> to vector<8x32xf32>
    %423 = vector.extract_strided_slice %421 {offsets = [0, 0], sizes = [8, 32], strides = [1, 1]} : vector<8x48xf32> to vector<8x32xf32>
    %424 = arith.addf %422, %423 : vector<8x32xf32>
    %425 = arith.negf %424 : vector<8x32xf32>
    %426 = math.exp %425 : vector<8x32xf32>
    %cst_115 = arith.constant 1.000000e+00 : f32
    %427 = vector.broadcast %cst_115 : f32 to vector<8x32xf32>
    %428 = arith.addf %427, %426 : vector<8x32xf32>
    %429 = arith.divf %427, %428 : vector<8x32xf32>
    %430 = vector.extract_strided_slice %429 {offsets = [0, 0], sizes = [8, 16], strides = [1, 1]} : vector<8x32xf32> to vector<8x16xf32>
    %431 = vector.extract_strided_slice %429 {offsets = [0, 16], sizes = [8, 16], strides = [1, 1]} : vector<8x32xf32> to vector<8x16xf32>
    %432 = vector.extract_strided_slice %419 {offsets = [0, 32], sizes = [8, 16], strides = [1, 1]} : vector<8x48xf32> to vector<8x16xf32>
    %433 = vector.extract_strided_slice %421 {offsets = [0, 32], sizes = [8, 16], strides = [1, 1]} : vector<8x48xf32> to vector<8x16xf32>
    %434 = arith.mulf %430, %433 : vector<8x16xf32>
    %435 = arith.addf %432, %434 : vector<8x16xf32>
    %436 = math.tanh %435 : vector<8x16xf32>
    %cst_116 = arith.constant 1.000000e+00 : f32
    %437 = vector.broadcast %cst_116 : f32 to vector<8x16xf32>
    %438 = arith.subf %437, %431 : vector<8x16xf32>
    %439 = arith.mulf %438, %436 : vector<8x16xf32>
    %440 = arith.mulf %431, %417 : vector<8x16xf32>
    %441 = arith.addf %439, %440 : vector<8x16xf32>
    %c12_117 = arith.constant 12 : index
    %c0_118 = arith.constant 0 : index
    %c0_119 = arith.constant 0 : index
    %442 = vector.load %arg5[%c12_117, %c0_118, %c0_119] : memref<16x8x48xf32, #tpu.memory_space<vmem>>, vector<1x8x48xf32>
    %443 = vector.shape_cast %442 : vector<1x8x48xf32> to vector<8x48xf32>
    %cst_120 = arith.constant dense<0.000000e+00> : vector<8x48xf32>
    %444 = tpu.matmul %441, %5, %cst_120 {dimension_numbers = #tpu.dot_dimension_numbers<[1], [0], [0], [1], [0, 0, 1, 1], [], []>} : vector<8x16xf32>, vector<16x48xf32>, vector<8x48xf32> -> vector<8x48xf32>
    %445 = arith.addf %444, %152 : vector<8x48xf32>
    %446 = vector.extract_strided_slice %443 {offsets = [0, 0], sizes = [8, 32], strides = [1, 1]} : vector<8x48xf32> to vector<8x32xf32>
    %447 = vector.extract_strided_slice %445 {offsets = [0, 0], sizes = [8, 32], strides = [1, 1]} : vector<8x48xf32> to vector<8x32xf32>
    %448 = arith.addf %446, %447 : vector<8x32xf32>
    %449 = arith.negf %448 : vector<8x32xf32>
    %450 = math.exp %449 : vector<8x32xf32>
    %cst_121 = arith.constant 1.000000e+00 : f32
    %451 = vector.broadcast %cst_121 : f32 to vector<8x32xf32>
    %452 = arith.addf %451, %450 : vector<8x32xf32>
    %453 = arith.divf %451, %452 : vector<8x32xf32>
    %454 = vector.extract_strided_slice %453 {offsets = [0, 0], sizes = [8, 16], strides = [1, 1]} : vector<8x32xf32> to vector<8x16xf32>
    %455 = vector.extract_strided_slice %453 {offsets = [0, 16], sizes = [8, 16], strides = [1, 1]} : vector<8x32xf32> to vector<8x16xf32>
    %456 = vector.extract_strided_slice %443 {offsets = [0, 32], sizes = [8, 16], strides = [1, 1]} : vector<8x48xf32> to vector<8x16xf32>
    %457 = vector.extract_strided_slice %445 {offsets = [0, 32], sizes = [8, 16], strides = [1, 1]} : vector<8x48xf32> to vector<8x16xf32>
    %458 = arith.mulf %454, %457 : vector<8x16xf32>
    %459 = arith.addf %456, %458 : vector<8x16xf32>
    %460 = math.tanh %459 : vector<8x16xf32>
    %cst_122 = arith.constant 1.000000e+00 : f32
    %461 = vector.broadcast %cst_122 : f32 to vector<8x16xf32>
    %462 = arith.subf %461, %455 : vector<8x16xf32>
    %463 = arith.mulf %462, %460 : vector<8x16xf32>
    %464 = arith.mulf %455, %441 : vector<8x16xf32>
    %465 = arith.addf %463, %464 : vector<8x16xf32>
    %c13_123 = arith.constant 13 : index
    %c0_124 = arith.constant 0 : index
    %c0_125 = arith.constant 0 : index
    %466 = vector.load %arg5[%c13_123, %c0_124, %c0_125] : memref<16x8x48xf32, #tpu.memory_space<vmem>>, vector<1x8x48xf32>
    %467 = vector.shape_cast %466 : vector<1x8x48xf32> to vector<8x48xf32>
    %cst_126 = arith.constant dense<0.000000e+00> : vector<8x48xf32>
    %468 = tpu.matmul %465, %5, %cst_126 {dimension_numbers = #tpu.dot_dimension_numbers<[1], [0], [0], [1], [0, 0, 1, 1], [], []>} : vector<8x16xf32>, vector<16x48xf32>, vector<8x48xf32> -> vector<8x48xf32>
    %469 = arith.addf %468, %152 : vector<8x48xf32>
    %470 = vector.extract_strided_slice %467 {offsets = [0, 0], sizes = [8, 32], strides = [1, 1]} : vector<8x48xf32> to vector<8x32xf32>
    %471 = vector.extract_strided_slice %469 {offsets = [0, 0], sizes = [8, 32], strides = [1, 1]} : vector<8x48xf32> to vector<8x32xf32>
    %472 = arith.addf %470, %471 : vector<8x32xf32>
    %473 = arith.negf %472 : vector<8x32xf32>
    %474 = math.exp %473 : vector<8x32xf32>
    %cst_127 = arith.constant 1.000000e+00 : f32
    %475 = vector.broadcast %cst_127 : f32 to vector<8x32xf32>
    %476 = arith.addf %475, %474 : vector<8x32xf32>
    %477 = arith.divf %475, %476 : vector<8x32xf32>
    %478 = vector.extract_strided_slice %477 {offsets = [0, 0], sizes = [8, 16], strides = [1, 1]} : vector<8x32xf32> to vector<8x16xf32>
    %479 = vector.extract_strided_slice %477 {offsets = [0, 16], sizes = [8, 16], strides = [1, 1]} : vector<8x32xf32> to vector<8x16xf32>
    %480 = vector.extract_strided_slice %467 {offsets = [0, 32], sizes = [8, 16], strides = [1, 1]} : vector<8x48xf32> to vector<8x16xf32>
    %481 = vector.extract_strided_slice %469 {offsets = [0, 32], sizes = [8, 16], strides = [1, 1]} : vector<8x48xf32> to vector<8x16xf32>
    %482 = arith.mulf %478, %481 : vector<8x16xf32>
    %483 = arith.addf %480, %482 : vector<8x16xf32>
    %484 = math.tanh %483 : vector<8x16xf32>
    %cst_128 = arith.constant 1.000000e+00 : f32
    %485 = vector.broadcast %cst_128 : f32 to vector<8x16xf32>
    %486 = arith.subf %485, %479 : vector<8x16xf32>
    %487 = arith.mulf %486, %484 : vector<8x16xf32>
    %488 = arith.mulf %479, %465 : vector<8x16xf32>
    %489 = arith.addf %487, %488 : vector<8x16xf32>
    %c14_129 = arith.constant 14 : index
    %c0_130 = arith.constant 0 : index
    %c0_131 = arith.constant 0 : index
    %490 = vector.load %arg5[%c14_129, %c0_130, %c0_131] : memref<16x8x48xf32, #tpu.memory_space<vmem>>, vector<1x8x48xf32>
    %491 = vector.shape_cast %490 : vector<1x8x48xf32> to vector<8x48xf32>
    %cst_132 = arith.constant dense<0.000000e+00> : vector<8x48xf32>
    %492 = tpu.matmul %489, %5, %cst_132 {dimension_numbers = #tpu.dot_dimension_numbers<[1], [0], [0], [1], [0, 0, 1, 1], [], []>} : vector<8x16xf32>, vector<16x48xf32>, vector<8x48xf32> -> vector<8x48xf32>
    %493 = arith.addf %492, %152 : vector<8x48xf32>
    %494 = vector.extract_strided_slice %491 {offsets = [0, 0], sizes = [8, 32], strides = [1, 1]} : vector<8x48xf32> to vector<8x32xf32>
    %495 = vector.extract_strided_slice %493 {offsets = [0, 0], sizes = [8, 32], strides = [1, 1]} : vector<8x48xf32> to vector<8x32xf32>
    %496 = arith.addf %494, %495 : vector<8x32xf32>
    %497 = arith.negf %496 : vector<8x32xf32>
    %498 = math.exp %497 : vector<8x32xf32>
    %cst_133 = arith.constant 1.000000e+00 : f32
    %499 = vector.broadcast %cst_133 : f32 to vector<8x32xf32>
    %500 = arith.addf %499, %498 : vector<8x32xf32>
    %501 = arith.divf %499, %500 : vector<8x32xf32>
    %502 = vector.extract_strided_slice %501 {offsets = [0, 0], sizes = [8, 16], strides = [1, 1]} : vector<8x32xf32> to vector<8x16xf32>
    %503 = vector.extract_strided_slice %501 {offsets = [0, 16], sizes = [8, 16], strides = [1, 1]} : vector<8x32xf32> to vector<8x16xf32>
    %504 = vector.extract_strided_slice %491 {offsets = [0, 32], sizes = [8, 16], strides = [1, 1]} : vector<8x48xf32> to vector<8x16xf32>
    %505 = vector.extract_strided_slice %493 {offsets = [0, 32], sizes = [8, 16], strides = [1, 1]} : vector<8x48xf32> to vector<8x16xf32>
    %506 = arith.mulf %502, %505 : vector<8x16xf32>
    %507 = arith.addf %504, %506 : vector<8x16xf32>
    %508 = math.tanh %507 : vector<8x16xf32>
    %cst_134 = arith.constant 1.000000e+00 : f32
    %509 = vector.broadcast %cst_134 : f32 to vector<8x16xf32>
    %510 = arith.subf %509, %503 : vector<8x16xf32>
    %511 = arith.mulf %510, %508 : vector<8x16xf32>
    %512 = arith.mulf %503, %489 : vector<8x16xf32>
    %513 = arith.addf %511, %512 : vector<8x16xf32>
    %c15_135 = arith.constant 15 : index
    %c0_136 = arith.constant 0 : index
    %c0_137 = arith.constant 0 : index
    %514 = vector.load %arg5[%c15_135, %c0_136, %c0_137] : memref<16x8x48xf32, #tpu.memory_space<vmem>>, vector<1x8x48xf32>
    %515 = vector.shape_cast %514 : vector<1x8x48xf32> to vector<8x48xf32>
    %cst_138 = arith.constant dense<0.000000e+00> : vector<8x48xf32>
    %516 = tpu.matmul %513, %5, %cst_138 {dimension_numbers = #tpu.dot_dimension_numbers<[1], [0], [0], [1], [0, 0, 1, 1], [], []>} : vector<8x16xf32>, vector<16x48xf32>, vector<8x48xf32> -> vector<8x48xf32>
    %517 = arith.addf %516, %152 : vector<8x48xf32>
    %518 = vector.extract_strided_slice %515 {offsets = [0, 0], sizes = [8, 32], strides = [1, 1]} : vector<8x48xf32> to vector<8x32xf32>
    %519 = vector.extract_strided_slice %517 {offsets = [0, 0], sizes = [8, 32], strides = [1, 1]} : vector<8x48xf32> to vector<8x32xf32>
    %520 = arith.addf %518, %519 : vector<8x32xf32>
    %521 = arith.negf %520 : vector<8x32xf32>
    %522 = math.exp %521 : vector<8x32xf32>
    %cst_139 = arith.constant 1.000000e+00 : f32
    %523 = vector.broadcast %cst_139 : f32 to vector<8x32xf32>
    %524 = arith.addf %523, %522 : vector<8x32xf32>
    %525 = arith.divf %523, %524 : vector<8x32xf32>
    %526 = vector.extract_strided_slice %525 {offsets = [0, 0], sizes = [8, 16], strides = [1, 1]} : vector<8x32xf32> to vector<8x16xf32>
    %527 = vector.extract_strided_slice %525 {offsets = [0, 16], sizes = [8, 16], strides = [1, 1]} : vector<8x32xf32> to vector<8x16xf32>
    %528 = vector.extract_strided_slice %515 {offsets = [0, 32], sizes = [8, 16], strides = [1, 1]} : vector<8x48xf32> to vector<8x16xf32>
    %529 = vector.extract_strided_slice %517 {offsets = [0, 32], sizes = [8, 16], strides = [1, 1]} : vector<8x48xf32> to vector<8x16xf32>
    %530 = arith.mulf %526, %529 : vector<8x16xf32>
    %531 = arith.addf %528, %530 : vector<8x16xf32>
    %532 = math.tanh %531 : vector<8x16xf32>
    %cst_140 = arith.constant 1.000000e+00 : f32
    %533 = vector.broadcast %cst_140 : f32 to vector<8x16xf32>
    %534 = arith.subf %533, %527 : vector<8x16xf32>
    %535 = arith.mulf %534, %532 : vector<8x16xf32>
    %536 = arith.mulf %527, %513 : vector<8x16xf32>
    %537 = arith.addf %535, %536 : vector<8x16xf32>
    %cst_141 = arith.constant 0.000000e+00 : f32
    %538 = vector.broadcast %cst_141 : f32 to vector<8x16xf32>
    %539 = arith.maximumf %537, %538 : vector<8x16xf32>
    %cst_142 = arith.constant dense<0.000000e+00> : vector<8x5xf32>
    %540 = tpu.matmul %539, %6, %cst_142 {dimension_numbers = #tpu.dot_dimension_numbers<[1], [0], [0], [1], [0, 0, 1, 1], [], []>} : vector<8x16xf32>, vector<16x5xf32>, vector<8x5xf32> -> vector<8x5xf32>
    %541 = vector.broadcast %4 : vector<1x5xf32> to vector<8x5xf32>
    %542 = arith.addf %540, %541 : vector<8x5xf32>
    %c0_143 = arith.constant 0 : index
    %c0_144 = arith.constant 0 : index
    %543 = vector.load %arg4[%c0_143, %c0_144] : memref<8x5xf32, #tpu.memory_space<vmem>>, vector<8x5xf32>
    tpu.vector_store %arg4[%c0_143, %c0_144], %542 {strides = array<i32>} : memref<8x5xf32, #tpu.memory_space<vmem>>, vector<8x5xf32>,
    return
  }
  func.func @transform_0(%arg0: i32) -> (i32, i32) {
    %c0_i32 = arith.constant 0 : i32
    %c0_i32_0 = arith.constant 0 : i32
    return %arg0, %c0_i32 : i32, i32
  }
  func.func @transform_1(%arg0: i32) -> (i32, i32) {
    %c0_i32 = arith.constant 0 : i32
    %c0_i32_0 = arith.constant 0 : i32
    %c0_i32_1 = arith.constant 0 : i32
    return %c0_i32, %c0_i32_0 : i32, i32
  }
  func.func @transform_2(%arg0: i32) -> (i32, i32) {
    %c0_i32 = arith.constant 0 : i32
    %c0_i32_0 = arith.constant 0 : i32
    %c0_i32_1 = arith.constant 0 : i32
    return %c0_i32, %c0_i32_0 : i32, i32
  }
  func.func @transform_3(%arg0: i32) -> (i32, i32) {
    %c0_i32 = arith.constant 0 : i32
    %c0_i32_0 = arith.constant 0 : i32
    return %arg0, %c0_i32 : i32, i32
  }
}

</mosaic_0001>

<bundles_post_ra>
// kernel: tpu_custom_call.1
= control target key start
LH: loop header
LB: loop body
LE: loop exit
PB: predicated region body
PF: predicated region fallthrough
CT: control target
= control target key end

     0   :  { %8 = vsyncpa [#allocation4], 0  ;;  %s1850_s0 = inlined_call_operand.hbm [shape: f32[8,16], index: 0, kind: input, shape index: {}]   ;;  %s1851_s1 = inlined_call_operand.hbm [shape: f32[16,53], index: 1, kind: input, shape index: {}]   ;;  %s1852_s2 = inlined_call_operand.hbm [shape: f32[4,48], index: 2, kind: input, shape index: {}]   ;;  %s1853_s3 = inlined_call_operand.hbm [shape: f32[8,5], index: 3, kind: output, shape index: {}]  }
   0x1   :  { %9 = vsyncpa [#allocation7], 0  ;;  %s26_s14 = sshll.u32 %s1851_s1, 4  ;;  %s27_s14 = int_to_ptr.hbm [resolvable:$true] %s26_s14 }
   0x2   :  { %10 = vsyncpa [#allocation5], 0  ;;  %s1579_s15 = smov [#allocation6]   ;;  %s16_s19 = sshll.u32 %s1850_s0, 4  ;;  %s17_s19 = int_to_ptr.hbm [resolvable:$true] %s16_s19 }
   0x3   :  { %s28_s16 = sshll.u32 %s1579_s15, 4  ;;  %s1580_s20 = smov 128   ;;  %s29_s16 = int_to_ptr.vmem [resolvable:$true] %s28_s16 }
   0x4   :  { %s1581_s21 = smov 8   ;;  %s1582_s22 = smov [#allocation3]  }
   0x5   :  { %34 = dma.hbm_to_vmem [thread:$0]  %s27_s14, 256, %s29_s16, [#allocation7], %s1580_s20, %s1580_s20, %s1581_s21  }
   0x6   :  { %s18_s23 = sshll.u32 %s1582_s22, 4  ;;  %s40_s26 = sshll.u32 %s1852_s2, 4  ;;  %s19_s23 = int_to_ptr.vmem [resolvable:$true] %s18_s23  ;;  %s41_s26 = int_to_ptr.hbm [resolvable:$true] %s40_s26 }
   0x7   :  { %21 = dma.hbm_to_vmem [thread:$0]  %s17_s19, 128, %s19_s23, [#allocation4]  }
   0x8   :  { %s1583_s1 = smov [#allocation8]  }
   0x9   :  { %s42_s27 = sshll.u32 %s1583_s1, 4  ;;  %s43_s27 = int_to_ptr.vmem [resolvable:$true] %s42_s27 }
   0xa   :  { %45 = dma.hbm_to_vmem [thread:$0]  %s41_s26, 64, %s43_s27, [#allocation7]  }
   0xb   :  { %1573 = dma.done.wait [#allocation4], 128  }
   0xc   :  { %1574 = vsyncadd [#allocation4], 4294967168 }
   0xd   :  { %1575 = dma.done.wait [#allocation7], 320  }
   0xe   :  { %1576 = vsyncadd [#allocation7], 4294966976  ;;  %v1584_v0 = vmov 0   ;;  %v1635_v1 = vld [vmem:[#allocation6 + $0x8] sm:$0xff]  ;;  %v1637_v2 = vld [vmem:[#allocation6] sm:$0xff]  ;;  %v1585_v4 = vmov 0.0  }
   0xf   :  { %1350 = vset.pattern.permute.xlu0 %v1584_v0  ;;  %v1639_v3 = vld [vmem:[#allocation3] sm:$0xff]  ;;  %216 = vmatpush.msra.mxu0 %v1635_v1  ;;  %v1660_v5 = vld [vmem:[#allocation8] ss:$0 sm:$0xff]  ;;  %v1662_v6 = vld [vmem:[#allocation8 + $0x1] ss:$0 sm:$0xff]  ;;  %vm74_vm0 = vcmask 392192  }
  0x10   :  { %67 = vperm.xlu0 %1350, %v1639_v3   ;;  %281 = vmatpush.msra.mxu1 %v1635_v1  ;;  %v1667_v10 = vld [vmem:[#allocation8 + $0x2] ss:$0 sm:$0xff]  ;;  %s1586_s0 = smov 96   ;;  %s1587_s2 = smov 32   ;;  %v1589_v38 = vmov 1   ;;  %vm198_vm5 = vcmask 130048  }
  0x11   :  { %346 = vmatpush.msra.mxu2 %v1635_v1  ;;  %217 = vmatpush.msra.mxu0 %v1637_v2  ;;  %s1588_s28 = smov 112   ;;  %s1604_s29 = smov 80  }
  0x12   :  { %411 = vmatpush.msra.mxu3 %v1635_v1  ;;  %218 = vmatmul.f32.vlgmr.msra.gmra.mxu0 %v1585_v4  ;;  %s1605_s30 = smov [#allocation9]   ;;  %s1280_s7 = sshll.u32 %s1853_s3, 4  ;;  %s1281_s7 = int_to_ptr.hbm [resolvable:$true] %s1280_s7 }
  0x13   :  { %282 = vmatpush.msra.mxu1 %v1637_v2  ;;  %347 = vmatpush.msra.mxu2 %v1637_v2  ;;  %s1278_s4 = sshll.u32 %s1605_s30, 4  ;;  %s1279_s4 = int_to_ptr.vmem [resolvable:$true] %s1278_s4 }
  0x14   :  { %412 = vmatpush.msra.mxu3 %v1637_v2  ;;  %476 = vmatpush.msrb.mxu0 %v1635_v1 }
  0x15   :  { %541 = vmatpush.msrb.mxu1 %v1635_v1  ;;  %606 = vmatpush.msrb.mxu2 %v1635_v1 }
  0x16   :  { %671 = vmatpush.msrb.mxu3 %v1635_v1  ;;  %477 = vmatpush.msrb.mxu0 %v1637_v2 }
  0x17   :  { %542 = vmatpush.msrb.mxu1 %v1637_v2  ;;  %607 = vmatpush.msrb.mxu2 %v1637_v2 }
  0x18   :  { %672 = vmatpush.msrb.mxu3 %v1637_v2  ;;  %736 = vmatpush.msra.mxu0 %v1635_v1 }
  0x19   :  { %1351 = vset.pattern.permute.xlu2 %v1589_v38 }
  0x1a   :  { %737 = vmatpush.msra.mxu0 %v1637_v2 }
  0x82   :  { %v68_v7 = vpop.permute.xlu0 %67 }
  0x83   :  { %v71_v8 = vmul.f32 %v1660_v5, %v68_v7 }
  0x85   :  { %v73_v9 = vadd.f32 %v1662_v6, %v71_v8 }
  0x87   :  { %75 = vst.msk [vmem:[#allocation2] sm:$0xff] %vm74_vm0, %v73_v9 }
  0x8e   :  { %v197_v13 = vld [vmem:[#allocation2] sm:$0xff] }
  0x8f   :  { %v219_v11 = vpop.f32.mrf.mxu0 }
  0x90   :  { %v220_v12 = vadd.f32 %v1667_v10, %v219_v11 }
  0x92   :  { %243 = vrot.lane.b32.xlu0 %v220_v12, %s1586_s0  ;;  %v222_v14 = vadd.f32 %v220_v12, %v197_v13  ;;  %v1590_v12 = vmov 2  }
  0x93   :  { %1352 = vset.pattern.permute.xlu1 %v1590_v12 }
  0x94   :  { %v1291_v15 = vmul.f32 -1.442695, %v222_v14 }
  0x96   :  { %1375 = vpow2.f32 %v1291_v15 }
  0x9c   :  { %v1376_v16 = vpop.eup %1375 }
  0x9d   :  { %v226_v17 = vadd.f32 1.0, %v1376_v16 }
  0x9f   :  { %1377 = vrcp.f32 %v226_v17  ;;  %v238_v23 = vand.u32 2147483648, %v226_v17  ;;  %vm232_vm2 = vweird.f32 %v226_v17  ;;  %v236_v24 = vand.u32 2147483647, %v226_v17 }
  0xa1   :  { %v239_v26 = vor.u32 1.1754944e-38, %v238_v23  ;;  %vm237_vm4 = vcmp.eq.f32.partialorder %v236_v24, 8.507059e+37 }
  0xa5   :  { %v1378_v18 = vpop.eup %1377 }
  0xa6   :  { %v228_v19 = vmul.f32 %v1378_v18, %v226_v17  ;;  %vm233_vm1 = vweird.f32 %v1378_v18 }
  0xa7   :  { %vm234_vm3 = vmor %vm232_vm2, %vm233_vm1 }
  0xa8   :  { %v229_v20 = vsub.f32 1.0, %v228_v19 }
  0xaa   :  { %v230_v21 = vmul.f32 %v1378_v18, %v229_v20 }
  0xac   :  { %v231_v22 = vadd.f32 %v1378_v18, %v230_v21 }
  0xae   :  { %v235_v25 = vsel %vm234_vm3, %v1378_v18, %v231_v22 }
  0xaf   :  { %v240_v27 = vsel %vm237_vm4, %v239_v26, %v235_v25 }
  0xb0   :  { %v253_v33 = vsub.f32 1.0, %v240_v27  ;;  %v259_v36 = vmul.f32 0.0, %v240_v27 }
 0x104   :  { %v244_v28 = vpop.permute.xlu0 %243 }
 0x105   :  { %v246_v29 = vmul.f32 %v244_v28, %v240_v27 }
 0x107   :  { %248 = vrot.lane.b32.xlu1 %v246_v29, %s1587_s2 }
 0x179   :  { %v249_v30 = vpop.permute.xlu1 %248 }
 0x17a   :  { %v251_v31 = vadd.f32 %v249_v30, %v197_v13 }
 0x17c   :  { %1379 = vtanh.f32 %v251_v31 }
 0x182   :  { %v1380_v32 = vpop.eup %1379 }
 0x183   :  { %255 = vrot.lane.b32.xlu1 %v1380_v32, %s1588_s28 }
 0x1f5   :  { %v256_v34 = vpop.permute.xlu1 %255 }
 0x1f6   :  { %v258_v35 = vmul.f32 %v256_v34, %v253_v33 }
 0x1f8   :  { %v260_v37 = vadd.f32 %v259_v36, %v258_v35 }
 0x1fa   :  { %263 = vrot.lane.b32.xlu2 %v260_v37, %s1588_s28 }
 0x202   :  { %77 = vperm.xlu2 %1351, %v1639_v3  }
 0x254   :  { %v264_v39 = vpop.permute.xlu2 %263 }
 0x255   :  { %1292 = vmatmul.msk.f32.vlgmr.msra.gmra.mxu1 %vm198_vm5, %v264_v39 }
 0x256   :  { %801 = vmatpush.msra.mxu1 %v1635_v1 }
 0x258   :  { %802 = vmatpush.msra.mxu1 %v1637_v2 }
 0x25c   :  { %v78_v40 = vpop.permute.xlu2 %77 }
 0x25d   :  { %v80_v41 = vmul.f32 %v1660_v5, %v78_v40 }
 0x25f   :  { %v81_v42 = vadd.f32 %v1662_v6, %v80_v41 }
 0x261   :  { %83 = vst.msk [vmem:[#allocation2 + $0x8] sm:$0xff] %vm74_vm0, %v81_v42 }
 0x268   :  { %v261_v45 = vld [vmem:[#allocation2 + $0x8] sm:$0xff] }
 0x2d2   :  { %v284_v43 = vpop.f32.mrf.mxu1 }
 0x2d3   :  { %v285_v44 = vadd.f32 %v1667_v10, %v284_v43 }
 0x2d5   :  { %308 = vrot.lane.b32.xlu0 %v285_v44, %s1586_s0  ;;  %v287_v46 = vadd.f32 %v285_v44, %v261_v45  ;;  %v1591_v44 = vmov 3  }
 0x2d6   :  { %1353 = vset.pattern.permute.xlu0 %v1591_v44 }
 0x2d7   :  { %v1293_v47 = vmul.f32 -1.442695, %v287_v46 }
 0x2d9   :  { %1381 = vpow2.f32 %v1293_v47 }
 0x2df   :  { %v1382_v48 = vpop.eup %1381 }
 0x2e0   :  { %v291_v49 = vadd.f32 1.0, %v1382_v48 }
 0x2e2   :  { %1383 = vrcp.f32 %v291_v49  ;;  %v303_v55 = vand.u32 2147483648, %v291_v49  ;;  %vm297_vm7 = vweird.f32 %v291_v49  ;;  %v301_v56 = vand.u32 2147483647, %v291_v49 }
 0x2e4   :  { %v304_v58 = vor.u32 1.1754944e-38, %v303_v55  ;;  %vm302_vm9 = vcmp.eq.f32.partialorder %v301_v56, 8.507059e+37 }
 0x2e8   :  { %v1384_v50 = vpop.eup %1383 }
 0x2e9   :  { %v293_v51 = vmul.f32 %v1384_v50, %v291_v49  ;;  %vm298_vm6 = vweird.f32 %v1384_v50 }
 0x2ea   :  { %vm299_vm8 = vmor %vm297_vm7, %vm298_vm6 }
 0x2eb   :  { %v294_v52 = vsub.f32 1.0, %v293_v51 }
 0x2ed   :  { %v295_v53 = vmul.f32 %v1384_v50, %v294_v52 }
 0x2ef   :  { %v296_v54 = vadd.f32 %v1384_v50, %v295_v53 }
 0x2f1   :  { %v300_v57 = vsel %vm299_vm8, %v1384_v50, %v296_v54 }
 0x2f2   :  { %v305_v60 = vsel %vm302_vm9, %v304_v58, %v300_v57 }
 0x2f3   :  { %v318_v4 = vsub.f32 1.0, %v305_v60  ;;  %v324_v8 = vmul.f32 %v305_v60, %v260_v37 }
 0x347   :  { %v309_v59 = vpop.permute.xlu0 %308 }
 0x348   :  { %v311_v61 = vmul.f32 %v309_v59, %v305_v60 }
 0x34a   :  { %313 = vrot.lane.b32.xlu1 %v311_v61, %s1587_s2 }
 0x352   :  { %85 = vperm.xlu1 %1352, %v1639_v3  }
 0x3bc   :  { %v314_v62 = vpop.permute.xlu1 %313 }
 0x3bd   :  { %v316_v63 = vadd.f32 %v314_v62, %v261_v45 }
 0x3bf   :  { %1385 = vtanh.f32 %v316_v63 }
 0x3c4   :  { %v86_v14 = vpop.permute.xlu1 %85 }
 0x3c5   :  { %v1386_v0 = vpop.eup %1385  ;;  %v88_v15 = vmul.f32 %v1660_v5, %v86_v14 }
 0x3c6   :  { %320 = vrot.lane.b32.xlu2 %v1386_v0, %s1588_s28 }
 0x3c7   :  { %v89_v16 = vadd.f32 %v1662_v6, %v88_v15 }
 0x3c9   :  { %91 = vst.msk [vmem:[#allocation2 + $0x10] sm:$0xff] %vm74_vm0, %v89_v16 }
 0x3d0   :  { %v326_v19 = vld [vmem:[#allocation2 + $0x10] sm:$0xff] }
 0x420   :  { %v321_v7 = vpop.permute.xlu2 %320 }
 0x421   :  { %v323_v9 = vmul.f32 %v321_v7, %v318_v4 }
 0x423   :  { %v325_v11 = vadd.f32 %v324_v8, %v323_v9 }
 0x425   :  { %328 = vrot.lane.b32.xlu0 %v325_v11, %s1588_s28 }
 0x497   :  { %v329_v13 = vpop.permute.xlu0 %328 }
 0x498   :  { %1294 = vmatmul.msk.f32.vlgmr.msra.gmra.mxu2 %vm198_vm5, %v329_v13 }
 0x499   :  { %866 = vmatpush.msra.mxu2 %v1635_v1 }
 0x49b   :  { %867 = vmatpush.msra.mxu2 %v1637_v2 }
 0x51b   :  { %v349_v17 = vpop.f32.mrf.mxu2 }
 0x51c   :  { %v350_v18 = vadd.f32 %v1667_v10, %v349_v17 }
 0x51e   :  { %373 = vrot.lane.b32.xlu2 %v350_v18, %s1586_s0  ;;  %v352_v20 = vadd.f32 %v350_v18, %v326_v19  ;;  %v1592_v18 = vmov 4  }
 0x520   :  { %v1295_v21 = vmul.f32 -1.442695, %v352_v20 }
 0x522   :  { %1387 = vpow2.f32 %v1295_v21 }
 0x528   :  { %v1388_v22 = vpop.eup %1387 }
 0x529   :  { %v356_v23 = vadd.f32 1.0, %v1388_v22 }
 0x52b   :  { %1389 = vrcp.f32 %v356_v23  ;;  %v368_v29 = vand.u32 2147483648, %v356_v23  ;;  %vm362_vm11 = vweird.f32 %v356_v23  ;;  %v366_v30 = vand.u32 2147483647, %v356_v23 }
 0x52d   :  { %v369_v32 = vor.u32 1.1754944e-38, %v368_v29  ;;  %vm367_vm13 = vcmp.eq.f32.partialorder %v366_v30, 8.507059e+37 }
 0x531   :  { %v1390_v24 = vpop.eup %1389 }
 0x532   :  { %v358_v25 = vmul.f32 %v1390_v24, %v356_v23  ;;  %vm363_vm10 = vweird.f32 %v1390_v24 }
 0x533   :  { %vm364_vm12 = vmor %vm362_vm11, %vm363_vm10 }
 0x534   :  { %v359_v26 = vsub.f32 1.0, %v358_v25 }
 0x536   :  { %v360_v27 = vmul.f32 %v1390_v24, %v359_v26 }
 0x538   :  { %v361_v28 = vadd.f32 %v1390_v24, %v360_v27 }
 0x53a   :  { %v365_v31 = vsel %vm364_vm12, %v1390_v24, %v361_v28 }
 0x53b   :  { %v370_v34 = vsel %vm367_vm13, %v369_v32, %v365_v31 }
 0x53c   :  { %v383_v39 = vsub.f32 1.0, %v370_v34  ;;  %v389_v41 = vmul.f32 %v370_v34, %v325_v11 }
 0x578   :  { %v374_v33 = vpop.permute.xlu2 %373 }
 0x579   :  { %v376_v35 = vmul.f32 %v374_v33, %v370_v34 }
 0x57b   :  { %378 = vrot.lane.b32.xlu0 %v376_v35, %s1587_s2 }
 0x583   :  { %93 = vperm.xlu0 %1353, %v1639_v3  }
 0x58b   :  { %1354 = vset.pattern.permute.xlu0 %v1592_v18 }
 0x58c   :  { %101 = vperm.xlu0 %1354, %v1639_v3  }
 0x5ed   :  { %v379_v36 = vpop.permute.xlu0 %378 }
 0x5ee   :  { %v381_v37 = vadd.f32 %v379_v36, %v326_v19 }
 0x5f0   :  { %1391 = vtanh.f32 %v381_v37 }
 0x5f5   :  { %v94_v46 = vpop.permute.xlu0 %93 }
 0x5f6   :  { %v1392_v38 = vpop.eup %1391  ;;  %v96_v47 = vmul.f32 %v1660_v5, %v94_v46 }
 0x5f7   :  { %385 = vrot.lane.b32.xlu1 %v1392_v38, %s1588_s28 }
 0x5f8   :  { %v97_v48 = vadd.f32 %v1662_v6, %v96_v47 }
 0x5fa   :  { %99 = vst.msk [vmem:[#allocation2 + $0x18] sm:$0xff] %vm74_vm0, %v97_v48 }
 0x5fe   :  { %v102_v20 = vpop.permute.xlu0 %101 }
 0x5ff   :  { %v104_v21 = vmul.f32 %v1660_v5, %v102_v20 }
 0x601   :  { %v391_v51 = vld [vmem:[#allocation2 + $0x18] sm:$0xff]  ;;  %v105_v22 = vadd.f32 %v1662_v6, %v104_v21 }
 0x603   :  { %107 = vst.msk [vmem:[#allocation2 + $0x20] sm:$0xff] %vm74_vm0, %v105_v22 }
 0x60a   :  { %v456_v25 = vld [vmem:[#allocation2 + $0x20] sm:$0xff] }
 0x669   :  { %v386_v40 = vpop.permute.xlu1 %385 }
 0x66a   :  { %v388_v42 = vmul.f32 %v386_v40, %v383_v39 }
 0x66c   :  { %v390_v43 = vadd.f32 %v389_v41, %v388_v42 }
 0x66e   :  { %393 = vrot.lane.b32.xlu2 %v390_v43, %s1588_s28 }
 0x6c8   :  { %v394_v45 = vpop.permute.xlu2 %393 }
 0x6c9   :  { %1296 = vmatmul.msk.f32.vlgmr.msra.gmra.mxu3 %vm198_vm5, %v394_v45 }
 0x6ca   :  { %931 = vmatpush.msra.mxu3 %v1635_v1 }
 0x6cc   :  { %932 = vmatpush.msra.mxu3 %v1637_v2 }
 0x74c   :  { %v414_v49 = vpop.f32.mrf.mxu3 }
 0x74d   :  { %v415_v50 = vadd.f32 %v1667_v10, %v414_v49 }
 0x74f   :  { %438 = vrot.lane.b32.xlu1 %v415_v50, %s1586_s0  ;;  %v417_v52 = vadd.f32 %v415_v50, %v391_v51  ;;  %v1593_v50 = vmov 5  }
 0x750   :  { %1355 = vset.pattern.permute.xlu0 %v1593_v50 }
 0x751   :  { %v1297_v53 = vmul.f32 -1.442695, %v417_v52  ;;  %109 = vperm.xlu0 %1355, %v1639_v3  }
 0x753   :  { %1393 = vpow2.f32 %v1297_v53 }
 0x759   :  { %v1394_v54 = vpop.eup %1393 }
 0x75a   :  { %v421_v55 = vadd.f32 1.0, %v1394_v54 }
 0x75c   :  { %1395 = vrcp.f32 %v421_v55  ;;  %v433_v61 = vand.u32 2147483648, %v421_v55  ;;  %vm427_vm15 = vweird.f32 %v421_v55  ;;  %v431_v62 = vand.u32 2147483647, %v421_v55 }
 0x75e   :  { %v434_v0 = vor.u32 1.1754944e-38, %v433_v61  ;;  %vm432_vm2 = vcmp.eq.f32.partialorder %v431_v62, 8.507059e+37 }
 0x762   :  { %v1396_v56 = vpop.eup %1395 }
 0x763   :  { %v423_v57 = vmul.f32 %v1396_v56, %v421_v55  ;;  %vm428_vm14 = vweird.f32 %v1396_v56 }
 0x764   :  { %vm429_vm1 = vmor %vm427_vm15, %vm428_vm14 }
 0x765   :  { %v424_v58 = vsub.f32 1.0, %v423_v57 }
 0x767   :  { %v425_v59 = vmul.f32 %v1396_v56, %v424_v58 }
 0x769   :  { %v426_v60 = vadd.f32 %v1396_v56, %v425_v59 }
 0x76b   :  { %v430_v63 = vsel %vm429_vm1, %v1396_v56, %v426_v60 }
 0x76c   :  { %v435_v7 = vsel %vm432_vm2, %v434_v0, %v430_v63 }
 0x76d   :  { %v448_v13 = vsub.f32 1.0, %v435_v7  ;;  %v454_v15 = vmul.f32 %v435_v7, %v390_v43 }
 0x7c1   :  { %v439_v4 = vpop.permute.xlu1 %438 }
 0x7c2   :  { %v441_v8 = vmul.f32 %v439_v4, %v435_v7 }
 0x7c3   :  { %v110_v52 = vpop.permute.xlu0 %109 }
 0x7c4   :  { %443 = vrot.lane.b32.xlu2 %v441_v8, %s1587_s2  ;;  %v112_v53 = vmul.f32 %v1660_v5, %v110_v52 }
 0x7c6   :  { %v113_v54 = vadd.f32 %v1662_v6, %v112_v53 }
 0x7c8   :  { %115 = vst.msk [vmem:[#allocation2 + $0x28] sm:$0xff] %vm74_vm0, %v113_v54 }
 0x7cf   :  { %v521_v57 = vld [vmem:[#allocation2 + $0x28] sm:$0xff] }
 0x81e   :  { %v444_v9 = vpop.permute.xlu2 %443 }
 0x81f   :  { %v446_v11 = vadd.f32 %v444_v9, %v391_v51 }
 0x821   :  { %1397 = vtanh.f32 %v446_v11 }
 0x827   :  { %v1398_v12 = vpop.eup %1397 }
 0x828   :  { %450 = vrot.lane.b32.xlu1 %v1398_v12, %s1588_s28 }
 0x89a   :  { %v451_v14 = vpop.permute.xlu1 %450 }
 0x89b   :  { %v453_v16 = vmul.f32 %v451_v14, %v448_v13 }
 0x89d   :  { %v455_v17 = vadd.f32 %v454_v15, %v453_v16 }
 0x89f   :  { %458 = vrot.lane.b32.xlu2 %v455_v17, %s1588_s28 }
 0x8f9   :  { %v459_v19 = vpop.permute.xlu2 %458 }
 0x8fa   :  { %1298 = vmatmul.msk.f32.vlgmr.msrb.gmra.mxu0 %vm198_vm5, %v459_v19 }
 0x8fb   :  { %996 = vmatpush.msrb.mxu0 %v1635_v1 }
 0x8fd   :  { %997 = vmatpush.msrb.mxu0 %v1637_v2 }
 0x977   :  { %v479_v23 = vpop.f32.mrf.mxu0 }
 0x978   :  { %v480_v24 = vadd.f32 %v1667_v10, %v479_v23 }
 0x97a   :  { %503 = vrot.lane.b32.xlu1 %v480_v24, %s1586_s0  ;;  %v482_v26 = vadd.f32 %v480_v24, %v456_v25  ;;  %v1594_v24 = vmov 6  }
 0x97b   :  { %1356 = vset.pattern.permute.xlu0 %v1594_v24 }
 0x97c   :  { %v1299_v27 = vmul.f32 -1.442695, %v482_v26  ;;  %117 = vperm.xlu0 %1356, %v1639_v3  }
 0x97e   :  { %1399 = vpow2.f32 %v1299_v27 }
 0x984   :  { %v1400_v28 = vpop.eup %1399 }
 0x985   :  { %v486_v29 = vadd.f32 1.0, %v1400_v28 }
 0x987   :  { %1401 = vrcp.f32 %v486_v29  ;;  %v498_v35 = vand.u32 2147483648, %v486_v29  ;;  %vm492_vm4 = vweird.f32 %v486_v29  ;;  %v496_v36 = vand.u32 2147483647, %v486_v29 }
 0x989   :  { %v499_v38 = vor.u32 1.1754944e-38, %v498_v35  ;;  %vm497_vm7 = vcmp.eq.f32.partialorder %v496_v36, 8.507059e+37 }
 0x98d   :  { %v1402_v30 = vpop.eup %1401 }
 0x98e   :  { %v488_v31 = vmul.f32 %v1402_v30, %v486_v29  ;;  %vm493_vm3 = vweird.f32 %v1402_v30 }
 0x98f   :  { %vm494_vm6 = vmor %vm492_vm4, %vm493_vm3 }
 0x990   :  { %v489_v32 = vsub.f32 1.0, %v488_v31 }
 0x992   :  { %v490_v33 = vmul.f32 %v1402_v30, %v489_v32 }
 0x994   :  { %v491_v34 = vadd.f32 %v1402_v30, %v490_v33 }
 0x996   :  { %v495_v37 = vsel %vm494_vm6, %v1402_v30, %v491_v34 }
 0x997   :  { %v500_v40 = vsel %vm497_vm7, %v499_v38, %v495_v37 }
 0x998   :  { %v513_v45 = vsub.f32 1.0, %v500_v40  ;;  %v519_v47 = vmul.f32 %v500_v40, %v455_v17 }
 0x9ec   :  { %v504_v39 = vpop.permute.xlu1 %503 }
 0x9ed   :  { %v506_v41 = vmul.f32 %v504_v39, %v500_v40 }
 0x9ee   :  { %v118_v26 = vpop.permute.xlu0 %117 }
 0x9ef   :  { %508 = vrot.lane.b32.xlu2 %v506_v41, %s1587_s2  ;;  %v120_v27 = vmul.f32 %v1660_v5, %v118_v26 }
 0x9f1   :  { %v121_v28 = vadd.f32 %v1662_v6, %v120_v27 }
 0x9f3   :  { %123 = vst.msk [vmem:[#allocation2 + $0x30] sm:$0xff] %vm74_vm0, %v121_v28  ;;  %v1596_v28 = vmov 8  }
 0x9fa   :  { %v586_v31 = vld [vmem:[#allocation2 + $0x30] sm:$0xff] }
 0xa49   :  { %v509_v42 = vpop.permute.xlu2 %508 }
 0xa4a   :  { %v511_v43 = vadd.f32 %v509_v42, %v456_v25 }
 0xa4c   :  { %1403 = vtanh.f32 %v511_v43 }
 0xa52   :  { %v1404_v44 = vpop.eup %1403 }
 0xa53   :  { %515 = vrot.lane.b32.xlu1 %v1404_v44, %s1588_s28 }
 0xac5   :  { %v516_v46 = vpop.permute.xlu1 %515 }
 0xac6   :  { %v518_v48 = vmul.f32 %v516_v46, %v513_v45 }
 0xac8   :  { %v520_v49 = vadd.f32 %v519_v47, %v518_v48 }
 0xaca   :  { %523 = vrot.lane.b32.xlu2 %v520_v49, %s1588_s28 }
 0xb24   :  { %v524_v51 = vpop.permute.xlu2 %523 }
 0xb25   :  { %1300 = vmatmul.msk.f32.vlgmr.msrb.gmra.mxu1 %vm198_vm5, %v524_v51 }
 0xb26   :  { %1061 = vmatpush.msrb.mxu1 %v1635_v1 }
 0xb28   :  { %1062 = vmatpush.msrb.mxu1 %v1637_v2 }
 0xba2   :  { %v544_v55 = vpop.f32.mrf.mxu1 }
 0xba3   :  { %v545_v56 = vadd.f32 %v1667_v10, %v544_v55 }
 0xba5   :  { %568 = vrot.lane.b32.xlu1 %v545_v56, %s1586_s0  ;;  %v547_v58 = vadd.f32 %v545_v56, %v521_v57  ;;  %v1595_v56 = vmov 7  }
 0xba6   :  { %1357 = vset.pattern.permute.xlu0 %v1595_v56 }
 0xba7   :  { %v1301_v59 = vmul.f32 -1.442695, %v547_v58  ;;  %125 = vperm.xlu0 %1357, %v1639_v3  }
 0xba9   :  { %1405 = vpow2.f32 %v1301_v59 }
 0xbaf   :  { %v1406_v60 = vpop.eup %1405  ;;  %1358 = vset.pattern.permute.xlu0 %v1596_v28 }
 0xbb0   :  { %v551_v61 = vadd.f32 1.0, %v1406_v60  ;;  %133 = vperm.xlu0 %1358, %v1639_v3  }
 0xbb2   :  { %1407 = vrcp.f32 %v551_v61  ;;  %v563_v8 = vand.u32 2147483648, %v551_v61  ;;  %vm557_vm9 = vweird.f32 %v551_v61  ;;  %v561_v9 = vand.u32 2147483647, %v551_v61 }
 0xbb4   :  { %v564_v12 = vor.u32 1.1754944e-38, %v563_v8  ;;  %vm562_vm11 = vcmp.eq.f32.partialorder %v561_v9, 8.507059e+37 }
 0xbb8   :  { %v1408_v62 = vpop.eup %1407 }
 0xbb9   :  { %v553_v63 = vmul.f32 %v1408_v62, %v551_v61  ;;  %vm558_vm8 = vweird.f32 %v1408_v62 }
 0xbba   :  { %vm559_vm10 = vmor %vm557_vm9, %vm558_vm8 }
 0xbbb   :  { %v554_v0 = vsub.f32 1.0, %v553_v63 }
 0xbbd   :  { %v555_v4 = vmul.f32 %v1408_v62, %v554_v0 }
 0xbbf   :  { %v556_v7 = vadd.f32 %v1408_v62, %v555_v4 }
 0xbc1   :  { %v560_v11 = vsel %vm559_vm10, %v1408_v62, %v556_v7 }
 0xbc2   :  { %v565_v14 = vsel %vm562_vm11, %v564_v12, %v560_v11 }
 0xbc3   :  { %v578_v19 = vsub.f32 1.0, %v565_v14  ;;  %v584_v21 = vmul.f32 %v565_v14, %v520_v49 }
 0xc17   :  { %v569_v13 = vpop.permute.xlu1 %568 }
 0xc18   :  { %v571_v15 = vmul.f32 %v569_v13, %v565_v14 }
 0xc19   :  { %v126_v58 = vpop.permute.xlu0 %125 }
 0xc1a   :  { %573 = vrot.lane.b32.xlu2 %v571_v15, %s1587_s2  ;;  %v128_v59 = vmul.f32 %v1660_v5, %v126_v58 }
 0xc1c   :  { %v129_v60 = vadd.f32 %v1662_v6, %v128_v59 }
 0xc1e   :  { %131 = vst.msk [vmem:[#allocation2 + $0x38] sm:$0xff] %vm74_vm0, %v129_v60  ;;  %v1597_v60 = vmov 9  }
 0xc1f   :  { %1359 = vset.pattern.permute.xlu0 %v1597_v60 }
 0xc20   :  { %141 = vperm.xlu0 %1359, %v1639_v3  }
 0xc25   :  { %v651_v63 = vld [vmem:[#allocation2 + $0x38] sm:$0xff] }
 0xc74   :  { %v574_v16 = vpop.permute.xlu2 %573 }
 0xc75   :  { %v576_v17 = vadd.f32 %v574_v16, %v521_v57 }
 0xc77   :  { %1409 = vtanh.f32 %v576_v17 }
 0xc7d   :  { %v1410_v18 = vpop.eup %1409 }
 0xc7e   :  { %580 = vrot.lane.b32.xlu1 %v1410_v18, %s1588_s28 }
 0xcf0   :  { %v581_v20 = vpop.permute.xlu1 %580 }
 0xcf1   :  { %v583_v22 = vmul.f32 %v581_v20, %v578_v19 }
 0xcf3   :  { %v585_v23 = vadd.f32 %v584_v21, %v583_v22 }
 0xcf5   :  { %588 = vrot.lane.b32.xlu2 %v585_v23, %s1588_s28 }
 0xd4f   :  { %v589_v25 = vpop.permute.xlu2 %588 }
 0xd50   :  { %1302 = vmatmul.msk.f32.vlgmr.msrb.gmra.mxu2 %vm198_vm5, %v589_v25 }
 0xd51   :  { %1126 = vmatpush.msrb.mxu2 %v1635_v1 }
 0xd53   :  { %1127 = vmatpush.msrb.mxu2 %v1637_v2 }
 0xdd3   :  { %v609_v29 = vpop.f32.mrf.mxu2 }
 0xdd4   :  { %v610_v30 = vadd.f32 %v1667_v10, %v609_v29 }
 0xdd6   :  { %633 = vrot.lane.b32.xlu1 %v610_v30, %s1586_s0  ;;  %v612_v32 = vadd.f32 %v610_v30, %v586_v31  ;;  %v134_v30 = vpop.permute.xlu0 %133 }
 0xdd8   :  { %v1303_v33 = vmul.f32 -1.442695, %v612_v32 }
 0xdda   :  { %1411 = vpow2.f32 %v1303_v33 }
 0xde0   :  { %v1412_v34 = vpop.eup %1411 }
 0xde1   :  { %v616_v35 = vadd.f32 1.0, %v1412_v34 }
 0xde3   :  { %1413 = vrcp.f32 %v616_v35  ;;  %v628_v41 = vand.u32 2147483648, %v616_v35  ;;  %vm622_vm13 = vweird.f32 %v616_v35  ;;  %v626_v42 = vand.u32 2147483647, %v616_v35 }
 0xde5   :  { %v629_v44 = vor.u32 1.1754944e-38, %v628_v41  ;;  %vm627_vm15 = vcmp.eq.f32.partialorder %v626_v42, 8.507059e+37 }
 0xde9   :  { %v1414_v36 = vpop.eup %1413 }
 0xdea   :  { %v618_v37 = vmul.f32 %v1414_v36, %v616_v35  ;;  %vm623_vm12 = vweird.f32 %v1414_v36 }
 0xdeb   :  { %vm624_vm14 = vmor %vm622_vm13, %vm623_vm12 }
 0xdec   :  { %v619_v38 = vsub.f32 1.0, %v618_v37 }
 0xdee   :  { %v620_v39 = vmul.f32 %v1414_v36, %v619_v38 }
 0xdf0   :  { %v621_v40 = vadd.f32 %v1414_v36, %v620_v39 }
 0xdf2   :  { %v625_v43 = vsel %vm624_vm14, %v1414_v36, %v621_v40 }
 0xdf3   :  { %v630_v46 = vsel %vm627_vm15, %v629_v44, %v625_v43 }
 0xdf4   :  { %v643_v51 = vsub.f32 1.0, %v630_v46  ;;  %v649_v53 = vmul.f32 %v630_v46, %v585_v23 }
 0xe48   :  { %v634_v45 = vpop.permute.xlu1 %633 }
 0xe49   :  { %v636_v47 = vmul.f32 %v634_v45, %v630_v46 }
 0xe4b   :  { %638 = vrot.lane.b32.xlu2 %v636_v47, %s1587_s2 }
 0xea5   :  { %v639_v48 = vpop.permute.xlu2 %638 }
 0xea6   :  { %v641_v49 = vadd.f32 %v639_v48, %v586_v31  ;;  %v136_v31 = vmul.f32 %v1660_v5, %v134_v30 }
 0xea8   :  { %1415 = vtanh.f32 %v641_v49  ;;  %v137_v32 = vadd.f32 %v1662_v6, %v136_v31  ;;  %v1598_v31 = vmov 10  }
 0xea9   :  { %1360 = vset.pattern.permute.xlu0 %v1598_v31 }
 0xeaa   :  { %139 = vst.msk [vmem:[#allocation2 + $0x40] sm:$0xff] %vm74_vm0, %v137_v32  ;;  %v1778_v32 = vld [vmem:[#allocation3] sm:$0xff] }
 0xeab   :  { %149 = vperm.xlu0 %1360, %v1778_v32  }
 0xeae   :  { %v1416_v50 = vpop.eup %1415 }
 0xeaf   :  { %645 = vrot.lane.b32.xlu1 %v1416_v50, %s1588_s28 }
 0xeb1   :  { %v716_v35 = vld [vmem:[#allocation2 + $0x40] sm:$0xff] }
 0xf21   :  { %v646_v52 = vpop.permute.xlu1 %645 }
 0xf22   :  { %v648_v54 = vmul.f32 %v646_v52, %v643_v51 }
 0xf24   :  { %v650_v55 = vadd.f32 %v649_v53, %v648_v54 }
 0xf26   :  { %653 = vrot.lane.b32.xlu2 %v650_v55, %s1588_s28 }
 0xf80   :  { %v654_v57 = vpop.permute.xlu2 %653 }
 0xf81   :  { %1304 = vmatmul.msk.f32.vlgmr.msrb.gmra.mxu3 %vm198_vm5, %v654_v57 }
 0xf82   :  { %1191 = vmatpush.msrb.mxu3 %v1635_v1 }
 0xf84   :  { %1192 = vmatpush.msrb.mxu3 %v1637_v2 }
0x1004   :  { %v674_v61 = vpop.f32.mrf.mxu3 }
0x1005   :  { %v675_v62 = vadd.f32 %v1667_v10, %v674_v61 }
0x1007   :  { %698 = vrot.lane.b32.xlu1 %v675_v62, %s1586_s0  ;;  %v677_v0 = vadd.f32 %v675_v62, %v651_v63  ;;  %v142_v62 = vpop.permute.xlu0 %141 }
0x1009   :  { %v1305_v4 = vmul.f32 -1.442695, %v677_v0 }
0x100b   :  { %1417 = vpow2.f32 %v1305_v4 }
0x1011   :  { %v1418_v7 = vpop.eup %1417 }
0x1012   :  { %v681_v1 = vadd.f32 1.0, %v1418_v7 }
0x1014   :  { %1419 = vrcp.f32 %v681_v1  ;;  %v693_v13 = vand.u32 2147483648, %v681_v1  ;;  %vm687_vm2 = vweird.f32 %v681_v1  ;;  %v691_v14 = vand.u32 2147483647, %v681_v1 }
0x1016   :  { %v694_v16 = vor.u32 1.1754944e-38, %v693_v13  ;;  %vm692_vm4 = vcmp.eq.f32.partialorder %v691_v14, 8.507059e+37 }
0x101a   :  { %v1420_v2 = vpop.eup %1419 }
0x101b   :  { %v683_v8 = vmul.f32 %v1420_v2, %v681_v1  ;;  %vm688_vm1 = vweird.f32 %v1420_v2 }
0x101c   :  { %vm689_vm3 = vmor %vm687_vm2, %vm688_vm1 }
0x101d   :  { %v684_v9 = vsub.f32 1.0, %v683_v8 }
0x101f   :  { %v685_v11 = vmul.f32 %v1420_v2, %v684_v9 }
0x1021   :  { %v686_v12 = vadd.f32 %v1420_v2, %v685_v11 }
0x1023   :  { %v690_v15 = vsel %vm689_vm3, %v1420_v2, %v686_v12 }
0x1024   :  { %v695_v18 = vsel %vm692_vm4, %v694_v16, %v690_v15 }
0x1025   :  { %v708_v23 = vsub.f32 1.0, %v695_v18  ;;  %v714_v25 = vmul.f32 %v695_v18, %v650_v55 }
0x1079   :  { %v699_v17 = vpop.permute.xlu1 %698 }
0x107a   :  { %v701_v19 = vmul.f32 %v699_v17, %v695_v18 }
0x107c   :  { %703 = vrot.lane.b32.xlu2 %v701_v19, %s1587_s2 }
0x10d6   :  { %v704_v20 = vpop.permute.xlu2 %703 }
0x10d7   :  { %v706_v21 = vadd.f32 %v704_v20, %v651_v63  ;;  %v144_v63 = vmul.f32 %v1660_v5, %v142_v62 }
0x10d9   :  { %1421 = vtanh.f32 %v706_v21  ;;  %v145_v0 = vadd.f32 %v1662_v6, %v144_v63 }
0x10db   :  { %147 = vst.msk [vmem:[#allocation2 + $0x48] sm:$0xff] %vm74_vm0, %v145_v0  ;;  %v1792_v0 = vld [vmem:[#allocation8] ss:$0 sm:$0xff] }
0x10df   :  { %v1422_v22 = vpop.eup %1421 }
0x10e0   :  { %710 = vrot.lane.b32.xlu1 %v1422_v22, %s1588_s28 }
0x10e2   :  { %v781_v1 = vld [vmem:[#allocation2 + $0x48] sm:$0xff] }
0x1152   :  { %v711_v24 = vpop.permute.xlu1 %710 }
0x1153   :  { %v713_v26 = vmul.f32 %v711_v24, %v708_v23 }
0x1155   :  { %v715_v27 = vadd.f32 %v714_v25, %v713_v26 }
0x1157   :  { %718 = vrot.lane.b32.xlu2 %v715_v27, %s1588_s28 }
0x11b1   :  { %v719_v29 = vpop.permute.xlu2 %718 }
0x11b2   :  { %1306 = vmatmul.msk.f32.vlgmr.msra.gmra.mxu0 %vm198_vm5, %v719_v29 }
0x122f   :  { %v739_v33 = vpop.f32.mrf.mxu0 }
0x1230   :  { %v740_v34 = vadd.f32 %v1667_v10, %v739_v33 }
0x1232   :  { %763 = vrot.lane.b32.xlu1 %v740_v34, %s1586_s0  ;;  %v742_v36 = vadd.f32 %v740_v34, %v716_v35  ;;  %v150_v34 = vpop.permute.xlu0 %149 }
0x1234   :  { %v1307_v37 = vmul.f32 -1.442695, %v742_v36 }
0x1236   :  { %1423 = vpow2.f32 %v1307_v37 }
0x123c   :  { %v1424_v38 = vpop.eup %1423 }
0x123d   :  { %v746_v39 = vadd.f32 1.0, %v1424_v38 }
0x123f   :  { %1425 = vrcp.f32 %v746_v39  ;;  %v758_v45 = vand.u32 2147483648, %v746_v39  ;;  %vm752_vm7 = vweird.f32 %v746_v39  ;;  %v756_v46 = vand.u32 2147483647, %v746_v39 }
0x1241   :  { %v759_v48 = vor.u32 1.1754944e-38, %v758_v45  ;;  %vm757_vm9 = vcmp.eq.f32.partialorder %v756_v46, 8.507059e+37 }
0x1245   :  { %v1426_v40 = vpop.eup %1425 }
0x1246   :  { %v748_v41 = vmul.f32 %v1426_v40, %v746_v39  ;;  %vm753_vm6 = vweird.f32 %v1426_v40 }
0x1247   :  { %vm754_vm8 = vmor %vm752_vm7, %vm753_vm6 }
0x1248   :  { %v749_v42 = vsub.f32 1.0, %v748_v41 }
0x124a   :  { %v750_v43 = vmul.f32 %v1426_v40, %v749_v42 }
0x124c   :  { %v751_v44 = vadd.f32 %v1426_v40, %v750_v43 }
0x124e   :  { %v755_v47 = vsel %vm754_vm8, %v1426_v40, %v751_v44 }
0x124f   :  { %v760_v50 = vsel %vm757_vm9, %v759_v48, %v755_v47 }
0x1250   :  { %v773_v55 = vsub.f32 1.0, %v760_v50  ;;  %v779_v57 = vmul.f32 %v760_v50, %v715_v27 }
0x12a4   :  { %v764_v49 = vpop.permute.xlu1 %763 }
0x12a5   :  { %v766_v51 = vmul.f32 %v764_v49, %v760_v50 }
0x12a7   :  { %768 = vrot.lane.b32.xlu2 %v766_v51, %s1587_s2 }
0x1301   :  { %v769_v52 = vpop.permute.xlu2 %768 }
0x1302   :  { %v771_v53 = vadd.f32 %v769_v52, %v716_v35  ;;  %v152_v35 = vmul.f32 %v1660_v5, %v150_v34 }
0x1304   :  { %1427 = vtanh.f32 %v771_v53  ;;  %v153_v36 = vadd.f32 %v1662_v6, %v152_v35 }
0x1306   :  { %155 = vst.msk [vmem:[#allocation2 + $0x50] sm:$0xff] %vm74_vm0, %v153_v36  ;;  %v1600_v36 = vmov 12  }
0x130a   :  { %v1428_v54 = vpop.eup %1427 }
0x130b   :  { %775 = vrot.lane.b32.xlu1 %v1428_v54, %s1588_s28 }
0x130d   :  { %v846_v39 = vld [vmem:[#allocation2 + $0x50] sm:$0xff] }
0x137d   :  { %v776_v56 = vpop.permute.xlu1 %775 }
0x137e   :  { %v778_v58 = vmul.f32 %v776_v56, %v773_v55 }
0x1380   :  { %v780_v59 = vadd.f32 %v779_v57, %v778_v58 }
0x1382   :  { %783 = vrot.lane.b32.xlu2 %v780_v59, %s1588_s28 }
0x13dc   :  { %v784_v61 = vpop.permute.xlu2 %783 }
0x13dd   :  { %1308 = vmatmul.msk.f32.vlgmr.msra.gmra.mxu1 %vm198_vm5, %v784_v61  ;;  %v1599_v61 = vmov 11  }
0x13de   :  { %1361 = vset.pattern.permute.xlu0 %v1599_v61 }
0x13df   :  { %157 = vperm.xlu0 %1361, %v1778_v32  }
0x13e7   :  { %1362 = vset.pattern.permute.xlu0 %v1600_v36 }
0x13e8   :  { %165 = vperm.xlu0 %1362, %v1778_v32  }
0x1451   :  { %v158_v63 = vpop.permute.xlu0 %157 }
0x145a   :  { %v804_v4 = vpop.f32.mrf.mxu1 }
0x145b   :  { %v805_v7 = vadd.f32 %v1667_v10, %v804_v4  ;;  %v160_v4 = vmul.f32 %v1792_v0, %v158_v63 }
0x145d   :  { %828 = vrot.lane.b32.xlu1 %v805_v7, %s1586_s0  ;;  %v807_v2 = vadd.f32 %v805_v7, %v781_v1  ;;  %v1795_v7 = vld [vmem:[#allocation8 + $0x1] ss:$0 sm:$0xff] }
0x145f   :  { %v1309_v8 = vmul.f32 -1.442695, %v807_v2 }
0x1461   :  { %1429 = vpow2.f32 %v1309_v8  ;;  %v1799_v8 = vld [vmem:[#allocation8 + $0x2] ss:$0 sm:$0xff] }
0x1467   :  { %v1430_v3 = vpop.eup %1429 }
0x1468   :  { %v811_v9 = vadd.f32 1.0, %v1430_v3 }
0x146a   :  { %1431 = vrcp.f32 %v811_v9  ;;  %v823_v16 = vand.u32 2147483648, %v811_v9  ;;  %vm817_vm11 = vweird.f32 %v811_v9  ;;  %v821_v17 = vand.u32 2147483647, %v811_v9 }
0x146c   :  { %v824_v19 = vor.u32 1.1754944e-38, %v823_v16  ;;  %vm822_vm13 = vcmp.eq.f32.partialorder %v821_v17, 8.507059e+37 }
0x1470   :  { %v1432_v11 = vpop.eup %1431 }
0x1471   :  { %v813_v12 = vmul.f32 %v1432_v11, %v811_v9  ;;  %vm818_vm10 = vweird.f32 %v1432_v11 }
0x1472   :  { %vm819_vm12 = vmor %vm817_vm11, %vm818_vm10 }
0x1473   :  { %v814_v13 = vsub.f32 1.0, %v813_v12 }
0x1475   :  { %v815_v14 = vmul.f32 %v1432_v11, %v814_v13 }
0x1477   :  { %v816_v15 = vadd.f32 %v1432_v11, %v815_v14 }
0x1479   :  { %v820_v18 = vsel %vm819_vm12, %v1432_v11, %v816_v15 }
0x147a   :  { %v825_v21 = vsel %vm822_vm13, %v824_v19, %v820_v18 }
0x147b   :  { %v838_v26 = vsub.f32 1.0, %v825_v21  ;;  %v844_v28 = vmul.f32 %v825_v21, %v780_v59 }
0x14cf   :  { %v829_v20 = vpop.permute.xlu1 %828 }
0x14d0   :  { %v831_v22 = vmul.f32 %v829_v20, %v825_v21 }
0x14d2   :  { %833 = vrot.lane.b32.xlu2 %v831_v22, %s1587_s2 }
0x152c   :  { %v834_v23 = vpop.permute.xlu2 %833 }
0x152d   :  { %v836_v24 = vadd.f32 %v834_v23, %v781_v1  ;;  %v161_v1 = vadd.f32 %v1795_v7, %v160_v4 }
0x152f   :  { %1433 = vtanh.f32 %v836_v24  ;;  %163 = vst.msk [vmem:[#allocation2 + $0x58] sm:$0xff] %vm74_vm0, %v161_v1  ;;  %v1601_v1 = vmov 13  }
0x1530   :  { %1363 = vset.pattern.permute.xlu0 %v1601_v1 }
0x1531   :  { %173 = vperm.xlu0 %1363, %v1778_v32  }
0x1535   :  { %v1434_v25 = vpop.eup %1433 }
0x1536   :  { %840 = vrot.lane.b32.xlu1 %v1434_v25, %s1588_s28  ;;  %v911_v9 = vld [vmem:[#allocation2 + $0x58] sm:$0xff] }
0x15a8   :  { %v841_v27 = vpop.permute.xlu1 %840 }
0x15a9   :  { %v843_v29 = vmul.f32 %v841_v27, %v838_v26 }
0x15ab   :  { %v845_v30 = vadd.f32 %v844_v28, %v843_v29 }
0x15ad   :  { %848 = vrot.lane.b32.xlu2 %v845_v30, %s1588_s28 }
0x1607   :  { %v849_v33 = vpop.permute.xlu2 %848 }
0x1608   :  { %1310 = vmatmul.msk.f32.vlgmr.msra.gmra.mxu2 %vm198_vm5, %v849_v33 }
0x168b   :  { %v869_v37 = vpop.f32.mrf.mxu2 }
0x168c   :  { %v870_v38 = vadd.f32 %v1667_v10, %v869_v37 }
0x168e   :  { %893 = vrot.lane.b32.xlu1 %v870_v38, %s1586_s0  ;;  %v872_v40 = vadd.f32 %v870_v38, %v846_v39  ;;  %v166_v38 = vpop.permute.xlu0 %165 }
0x1690   :  { %v1311_v41 = vmul.f32 -1.442695, %v872_v40 }
0x1692   :  { %1435 = vpow2.f32 %v1311_v41 }
0x1698   :  { %v1436_v42 = vpop.eup %1435 }
0x1699   :  { %v876_v43 = vadd.f32 1.0, %v1436_v42 }
0x169b   :  { %1437 = vrcp.f32 %v876_v43  ;;  %v888_v6 = vand.u32 2147483648, %v876_v43  ;;  %vm882_vm15 = vweird.f32 %v876_v43  ;;  %v886_v48 = vand.u32 2147483647, %v876_v43 }
0x169d   :  { %v889_v49 = vor.u32 1.1754944e-38, %v888_v6  ;;  %vm887_vm2 = vcmp.eq.f32.partialorder %v886_v48, 8.507059e+37 }
0x16a1   :  { %v1438_v44 = vpop.eup %1437 }
0x16a2   :  { %v878_v45 = vmul.f32 %v1438_v44, %v876_v43  ;;  %vm883_vm14 = vweird.f32 %v1438_v44 }
0x16a3   :  { %vm884_vm1 = vmor %vm882_vm15, %vm883_vm14 }
0x16a4   :  { %v879_v46 = vsub.f32 1.0, %v878_v45 }
0x16a6   :  { %v880_v5 = vmul.f32 %v1438_v44, %v879_v46 }
0x16a8   :  { %v881_v47 = vadd.f32 %v1438_v44, %v880_v5 }
0x16aa   :  { %v885_v10 = vsel %vm884_vm1, %v1438_v44, %v881_v47 }
0x16ab   :  { %v890_v51 = vsel %vm887_vm2, %v889_v49, %v885_v10 }
0x16ac   :  { %v903_v56 = vsub.f32 1.0, %v890_v51  ;;  %v909_v58 = vmul.f32 %v890_v51, %v845_v30 }
0x1700   :  { %v894_v50 = vpop.permute.xlu1 %893 }
0x1701   :  { %v896_v52 = vmul.f32 %v894_v50, %v890_v51 }
0x1703   :  { %898 = vrot.lane.b32.xlu2 %v896_v52, %s1587_s2 }
0x175d   :  { %v899_v53 = vpop.permute.xlu2 %898 }
0x175e   :  { %v901_v54 = vadd.f32 %v899_v53, %v846_v39  ;;  %v168_v39 = vmul.f32 %v1792_v0, %v166_v38 }
0x1760   :  { %1439 = vtanh.f32 %v901_v54  ;;  %v169_v40 = vadd.f32 %v1795_v7, %v168_v39 }
0x1762   :  { %171 = vst.msk [vmem:[#allocation2 + $0x60] sm:$0xff] %vm74_vm0, %v169_v40  ;;  %v1602_v40 = vmov 14  }
0x1763   :  { %1364 = vset.pattern.permute.xlu0 %v1602_v40 }
0x1764   :  { %181 = vperm.xlu0 %1364, %v1778_v32  }
0x1766   :  { %v1440_v55 = vpop.eup %1439 }
0x1767   :  { %905 = vrot.lane.b32.xlu1 %v1440_v55, %s1588_s28 }
0x1769   :  { %v976_v43 = vld [vmem:[#allocation2 + $0x60] sm:$0xff] }
0x17d9   :  { %v906_v57 = vpop.permute.xlu1 %905 }
0x17da   :  { %v908_v59 = vmul.f32 %v906_v57, %v903_v56 }
0x17dc   :  { %v910_v60 = vadd.f32 %v909_v58, %v908_v59 }
0x17de   :  { %913 = vrot.lane.b32.xlu2 %v910_v60, %s1588_s28 }
0x1838   :  { %v914_v62 = vpop.permute.xlu2 %913 }
0x1839   :  { %1312 = vmatmul.msk.f32.vlgmr.msra.gmra.mxu3 %vm198_vm5, %v914_v62 }
0x18bc   :  { %v934_v2 = vpop.f32.mrf.mxu3 }
0x18bd   :  { %v935_v3 = vadd.f32 %v1799_v8, %v934_v2 }
0x18bf   :  { %958 = vrot.lane.b32.xlu1 %v935_v3, %s1586_s0  ;;  %v937_v11 = vadd.f32 %v935_v3, %v911_v9  ;;  %v174_v3 = vpop.permute.xlu0 %173 }
0x18c1   :  { %v1313_v12 = vmul.f32 -1.442695, %v937_v11 }
0x18c3   :  { %1441 = vpow2.f32 %v1313_v12 }
0x18c9   :  { %v1442_v13 = vpop.eup %1441 }
0x18ca   :  { %v941_v14 = vadd.f32 1.0, %v1442_v13 }
0x18cc   :  { %1443 = vrcp.f32 %v941_v14  ;;  %v953_v20 = vand.u32 2147483648, %v941_v14  ;;  %vm947_vm4 = vweird.f32 %v941_v14  ;;  %v951_v21 = vand.u32 2147483647, %v941_v14 }
0x18ce   :  { %v954_v23 = vor.u32 1.1754944e-38, %v953_v20  ;;  %vm952_vm7 = vcmp.eq.f32.partialorder %v951_v21, 8.507059e+37 }
0x18d2   :  { %v1444_v15 = vpop.eup %1443 }
0x18d3   :  { %v943_v16 = vmul.f32 %v1444_v15, %v941_v14  ;;  %vm948_vm3 = vweird.f32 %v1444_v15 }
0x18d4   :  { %vm949_vm6 = vmor %vm947_vm4, %vm948_vm3 }
0x18d5   :  { %v944_v17 = vsub.f32 1.0, %v943_v16 }
0x18d7   :  { %v945_v18 = vmul.f32 %v1444_v15, %v944_v17 }
0x18d9   :  { %v946_v19 = vadd.f32 %v1444_v15, %v945_v18 }
0x18db   :  { %v950_v22 = vsel %vm949_vm6, %v1444_v15, %v946_v19 }
0x18dc   :  { %v955_v25 = vsel %vm952_vm7, %v954_v23, %v950_v22 }
0x18dd   :  { %v968_v30 = vsub.f32 1.0, %v955_v25  ;;  %v974_v33 = vmul.f32 %v955_v25, %v910_v60 }
0x1931   :  { %v959_v24 = vpop.permute.xlu1 %958 }
0x1932   :  { %v961_v26 = vmul.f32 %v959_v24, %v955_v25 }
0x1934   :  { %963 = vrot.lane.b32.xlu2 %v961_v26, %s1587_s2 }
0x198e   :  { %v964_v27 = vpop.permute.xlu2 %963 }
0x198f   :  { %v966_v28 = vadd.f32 %v964_v27, %v911_v9  ;;  %v176_v9 = vmul.f32 %v1792_v0, %v174_v3 }
0x1991   :  { %1445 = vtanh.f32 %v966_v28  ;;  %v177_v11 = vadd.f32 %v1795_v7, %v176_v9 }
0x1993   :  { %179 = vst.msk [vmem:[#allocation2 + $0x68] sm:$0xff] %vm74_vm0, %v177_v11  ;;  %v1603_v11 = vmov 15  }
0x1994   :  { %1365 = vset.pattern.permute.xlu0 %v1603_v11 }
0x1995   :  { %189 = vperm.xlu0 %1365, %v1778_v32  }
0x1997   :  { %v1446_v29 = vpop.eup %1445 }
0x1998   :  { %970 = vrot.lane.b32.xlu1 %v1446_v29, %s1588_s28 }
0x199a   :  { %v1041_v14 = vld [vmem:[#allocation2 + $0x68] sm:$0xff] }
0x1a0a   :  { %v971_v31 = vpop.permute.xlu1 %970 }
0x1a0b   :  { %v973_v34 = vmul.f32 %v971_v31, %v968_v30 }
0x1a0d   :  { %v975_v35 = vadd.f32 %v974_v33, %v973_v34 }
0x1a0f   :  { %978 = vrot.lane.b32.xlu2 %v975_v35, %s1588_s28 }
0x1a69   :  { %v979_v37 = vpop.permute.xlu2 %978 }
0x1a6a   :  { %1314 = vmatmul.msk.f32.vlgmr.msrb.gmra.mxu0 %vm198_vm5, %v979_v37 }
0x1ae7   :  { %v999_v41 = vpop.f32.mrf.mxu0 }
0x1ae8   :  { %v1000_v42 = vadd.f32 %v1799_v8, %v999_v41 }
0x1aea   :  { %1023 = vrot.lane.b32.xlu1 %v1000_v42, %s1586_s0  ;;  %v1002_v44 = vadd.f32 %v1000_v42, %v976_v43  ;;  %v182_v42 = vpop.permute.xlu0 %181 }
0x1aec   :  { %v1315_v45 = vmul.f32 -1.442695, %v1002_v44 }
0x1aee   :  { %1447 = vpow2.f32 %v1315_v45 }
0x1af4   :  { %v1448_v46 = vpop.eup %1447 }
0x1af5   :  { %v1006_v5 = vadd.f32 1.0, %v1448_v46 }
0x1af7   :  { %1449 = vrcp.f32 %v1006_v5  ;;  %v1018_v50 = vand.u32 2147483648, %v1006_v5  ;;  %vm1012_vm9 = vweird.f32 %v1006_v5  ;;  %v1016_v51 = vand.u32 2147483647, %v1006_v5 }
0x1af9   :  { %v1019_v53 = vor.u32 1.1754944e-38, %v1018_v50  ;;  %vm1017_vm11 = vcmp.eq.f32.partialorder %v1016_v51, 8.507059e+37 }
0x1afd   :  { %v1450_v47 = vpop.eup %1449 }
0x1afe   :  { %v1008_v6 = vmul.f32 %v1450_v47, %v1006_v5  ;;  %vm1013_vm8 = vweird.f32 %v1450_v47 }
0x1aff   :  { %vm1014_vm10 = vmor %vm1012_vm9, %vm1013_vm8  ;;  %vm1271_vm9 = vcmask 39936  }
0x1b00   :  { %v1009_v48 = vsub.f32 1.0, %v1008_v6 }
0x1b02   :  { %v1010_v10 = vmul.f32 %v1450_v47, %v1009_v48 }
0x1b04   :  { %v1011_v49 = vadd.f32 %v1450_v47, %v1010_v10 }
0x1b06   :  { %v1015_v52 = vsel %vm1014_vm10, %v1450_v47, %v1011_v49 }
0x1b07   :  { %v1020_v55 = vsel %vm1017_vm11, %v1019_v53, %v1015_v52 }
0x1b08   :  { %v1033_v60 = vsub.f32 1.0, %v1020_v55  ;;  %v1039_v62 = vmul.f32 %v1020_v55, %v975_v35 }
0x1b5c   :  { %v1024_v54 = vpop.permute.xlu1 %1023 }
0x1b5d   :  { %v1026_v56 = vmul.f32 %v1024_v54, %v1020_v55 }
0x1b5f   :  { %1028 = vrot.lane.b32.xlu2 %v1026_v56, %s1587_s2 }
0x1bb9   :  { %v1029_v57 = vpop.permute.xlu2 %1028 }
0x1bba   :  { %v1031_v58 = vadd.f32 %v1029_v57, %v976_v43  ;;  %v184_v43 = vmul.f32 %v1792_v0, %v182_v42 }
0x1bbc   :  { %1451 = vtanh.f32 %v1031_v58  ;;  %v185_v44 = vadd.f32 %v1795_v7, %v184_v43 }
0x1bbe   :  { %187 = vst.msk [vmem:[#allocation2 + $0x70] sm:$0xff] %vm74_vm0, %v185_v44 }
0x1bc2   :  { %v1452_v59 = vpop.eup %1451 }
0x1bc3   :  { %1035 = vrot.lane.b32.xlu1 %v1452_v59, %s1588_s28 }
0x1bc5   :  { %v1106_v5 = vld [vmem:[#allocation2 + $0x70] sm:$0xff] }
0x1c35   :  { %v1036_v61 = vpop.permute.xlu1 %1035 }
0x1c36   :  { %v1038_v63 = vmul.f32 %v1036_v61, %v1033_v60 }
0x1c38   :  { %v1040_v4 = vadd.f32 %v1039_v62, %v1038_v63 }
0x1c3a   :  { %1043 = vrot.lane.b32.xlu2 %v1040_v4, %s1588_s28 }
0x1c94   :  { %v1044_v2 = vpop.permute.xlu2 %1043 }
0x1c95   :  { %1316 = vmatmul.msk.f32.vlgmr.msrb.gmra.mxu1 %vm198_vm5, %v1044_v2 }
0x1d12   :  { %v1064_v12 = vpop.f32.mrf.mxu1 }
0x1d13   :  { %v1065_v13 = vadd.f32 %v1799_v8, %v1064_v12 }
0x1d15   :  { %1088 = vrot.lane.b32.xlu1 %v1065_v13, %s1586_s0  ;;  %v1067_v15 = vadd.f32 %v1065_v13, %v1041_v14  ;;  %v190_v13 = vpop.permute.xlu0 %189 }
0x1d17   :  { %v1317_v16 = vmul.f32 -1.442695, %v1067_v15 }
0x1d19   :  { %1453 = vpow2.f32 %v1317_v16 }
0x1d1f   :  { %v1454_v17 = vpop.eup %1453 }
0x1d20   :  { %v1071_v18 = vadd.f32 1.0, %v1454_v17 }
0x1d22   :  { %1455 = vrcp.f32 %v1071_v18  ;;  %v1083_v24 = vand.u32 2147483648, %v1071_v18  ;;  %vm1077_vm13 = vweird.f32 %v1071_v18  ;;  %v1081_v25 = vand.u32 2147483647, %v1071_v18 }
0x1d24   :  { %v1084_v27 = vor.u32 1.1754944e-38, %v1083_v24  ;;  %vm1082_vm15 = vcmp.eq.f32.partialorder %v1081_v25, 8.507059e+37 }
0x1d28   :  { %v1456_v19 = vpop.eup %1455 }
0x1d29   :  { %v1073_v20 = vmul.f32 %v1456_v19, %v1071_v18  ;;  %vm1078_vm12 = vweird.f32 %v1456_v19 }
0x1d2a   :  { %vm1079_vm14 = vmor %vm1077_vm13, %vm1078_vm12 }
0x1d2b   :  { %v1074_v21 = vsub.f32 1.0, %v1073_v20 }
0x1d2d   :  { %v1075_v22 = vmul.f32 %v1456_v19, %v1074_v21 }
0x1d2f   :  { %v1076_v23 = vadd.f32 %v1456_v19, %v1075_v22 }
0x1d31   :  { %v1080_v26 = vsel %vm1079_vm14, %v1456_v19, %v1076_v23 }
0x1d32   :  { %v1085_v29 = vsel %vm1082_vm15, %v1084_v27, %v1080_v26 }
0x1d33   :  { %v1098_v35 = vsub.f32 1.0, %v1085_v29  ;;  %v1104_v37 = vmul.f32 %v1085_v29, %v1040_v4 }
0x1d87   :  { %v1089_v28 = vpop.permute.xlu1 %1088 }
0x1d88   :  { %v1091_v30 = vmul.f32 %v1089_v28, %v1085_v29 }
0x1d8a   :  { %1093 = vrot.lane.b32.xlu2 %v1091_v30, %s1587_s2 }
0x1de4   :  { %v1094_v31 = vpop.permute.xlu2 %1093 }
0x1de5   :  { %v1096_v33 = vadd.f32 %v1094_v31, %v1041_v14  ;;  %v192_v14 = vmul.f32 %v1792_v0, %v190_v13 }
0x1de7   :  { %1457 = vtanh.f32 %v1096_v33  ;;  %v193_v15 = vadd.f32 %v1795_v7, %v192_v14 }
0x1de9   :  { %195 = vst.msk [vmem:[#allocation2 + $0x78] sm:$0xff] %vm74_vm0, %v193_v15 }
0x1ded   :  { %v1458_v34 = vpop.eup %1457 }
0x1dee   :  { %1100 = vrot.lane.b32.xlu1 %v1458_v34, %s1588_s28 }
0x1df0   :  { %v1171_v18 = vld [vmem:[#allocation2 + $0x78] sm:$0xff] }
0x1e60   :  { %v1101_v36 = vpop.permute.xlu1 %1100 }
0x1e61   :  { %v1103_v38 = vmul.f32 %v1101_v36, %v1098_v35  ;;  %v1475_v35 = vld [vmem:[#allocation6 + $0x8] sm:$0xff]  ;;  %v1476_v36 = vld [vmem:[#allocation6] sm:$0xff] }
0x1e63   :  { %v1105_v39 = vadd.f32 %v1104_v37, %v1103_v38  ;;  %v1366_v37 = vpack.i.bf16 %v1476_v36, %v1475_v35 }
0x1e65   :  { %1108 = vrot.lane.b32.xlu2 %v1105_v39, %s1588_s28 }
0x1ebf   :  { %v1109_v41 = vpop.permute.xlu2 %1108 }
0x1ec0   :  { %1318 = vmatmul.msk.f32.vlgmr.msrb.gmra.mxu2 %vm198_vm5, %v1109_v41 }
0x1f43   :  { %v1129_v45 = vpop.f32.mrf.mxu2 }
0x1f44   :  { %v1130_v46 = vadd.f32 %v1799_v8, %v1129_v45 }
0x1f46   :  { %1153 = vrot.lane.b32.xlu1 %v1130_v46, %s1586_s0  ;;  %v1132_v47 = vadd.f32 %v1130_v46, %v1106_v5 }
0x1f48   :  { %v1319_v6 = vmul.f32 -1.442695, %v1132_v47  ;;  %v1374_v47 = vld [vmem:[#allocation8 + $0x3] ss:$0 sm:$0xff] }
0x1f4a   :  { %1459 = vpow2.f32 %v1319_v6 }
0x1f50   :  { %v1460_v48 = vpop.eup %1459 }
0x1f51   :  { %v1136_v10 = vadd.f32 1.0, %v1460_v48 }
0x1f53   :  { %1461 = vrcp.f32 %v1136_v10  ;;  %v1148_v54 = vand.u32 2147483648, %v1136_v10  ;;  %vm1142_vm2 = vweird.f32 %v1136_v10  ;;  %v1146_v55 = vand.u32 2147483647, %v1136_v10 }
0x1f55   :  { %v1149_v57 = vor.u32 1.1754944e-38, %v1148_v54  ;;  %vm1147_vm4 = vcmp.eq.f32.partialorder %v1146_v55, 8.507059e+37 }
0x1f59   :  { %v1462_v49 = vpop.eup %1461 }
0x1f5a   :  { %v1138_v50 = vmul.f32 %v1462_v49, %v1136_v10  ;;  %vm1143_vm1 = vweird.f32 %v1462_v49 }
0x1f5b   :  { %vm1144_vm3 = vmor %vm1142_vm2, %vm1143_vm1 }
0x1f5c   :  { %v1139_v51 = vsub.f32 1.0, %v1138_v50 }
0x1f5e   :  { %v1140_v52 = vmul.f32 %v1462_v49, %v1139_v51 }
0x1f60   :  { %v1141_v53 = vadd.f32 %v1462_v49, %v1140_v52 }
0x1f62   :  { %v1145_v56 = vsel %vm1144_vm3, %v1462_v49, %v1141_v53 }
0x1f63   :  { %v1150_v59 = vsel %vm1147_vm4, %v1149_v57, %v1145_v56 }
0x1f64   :  { %v1163_v4 = vsub.f32 1.0, %v1150_v59  ;;  %v1169_v2 = vmul.f32 %v1150_v59, %v1105_v39 }
0x1fb8   :  { %v1154_v58 = vpop.permute.xlu1 %1153 }
0x1fb9   :  { %v1156_v60 = vmul.f32 %v1154_v58, %v1150_v59 }
0x1fbb   :  { %1158 = vrot.lane.b32.xlu2 %v1156_v60, %s1587_s2 }
0x2015   :  { %v1159_v61 = vpop.permute.xlu2 %1158 }
0x2016   :  { %v1161_v62 = vadd.f32 %v1159_v61, %v1106_v5 }
0x2018   :  { %1463 = vtanh.f32 %v1161_v62 }
0x201e   :  { %v1464_v63 = vpop.eup %1463 }
0x201f   :  { %1165 = vrot.lane.b32.xlu1 %v1464_v63, %s1588_s28 }
0x2091   :  { %v1166_v1 = vpop.permute.xlu1 %1165 }
0x2092   :  { %v1168_v3 = vmul.f32 %v1166_v1, %v1163_v4 }
0x2094   :  { %v1170_v9 = vadd.f32 %v1169_v2, %v1168_v3 }
0x2096   :  { %1173 = vrot.lane.b32.xlu2 %v1170_v9, %s1588_s28 }
0x20f0   :  { %v1174_v12 = vpop.permute.xlu2 %1173 }
0x20f1   :  { %1320 = vmatmul.msk.f32.vlgmr.msrb.gmra.mxu3 %vm198_vm5, %v1174_v12 }
0x2174   :  { %v1194_v16 = vpop.f32.mrf.mxu3 }
0x2175   :  { %v1195_v17 = vadd.f32 %v1799_v8, %v1194_v16 }
0x2177   :  { %1218 = vrot.lane.b32.xlu1 %v1195_v17, %s1586_s0  ;;  %v1197_v19 = vadd.f32 %v1195_v17, %v1171_v18 }
0x2179   :  { %v1321_v20 = vmul.f32 -1.442695, %v1197_v19 }
0x217b   :  { %1465 = vpow2.f32 %v1321_v20 }
0x2181   :  { %v1466_v32 = vpop.eup %1465 }
0x2182   :  { %v1201_v21 = vadd.f32 1.0, %v1466_v32 }
0x2184   :  { %1467 = vrcp.f32 %v1201_v21  ;;  %v1213_v7 = vand.u32 2147483648, %v1201_v21  ;;  %vm1207_vm0 = vweird.f32 %v1201_v21  ;;  %v1211_v26 = vand.u32 2147483647, %v1201_v21 }
0x2186   :  { %v1214_v27 = vor.u32 1.1754944e-38, %v1213_v7  ;;  %vm1212_vm8 = vcmp.eq.f32.partialorder %v1211_v26, 8.507059e+37 }
0x218a   :  { %v1468_v22 = vpop.eup %1467 }
0x218b   :  { %v1203_v23 = vmul.f32 %v1468_v22, %v1201_v21  ;;  %vm1208_vm6 = vweird.f32 %v1468_v22 }
0x218c   :  { %vm1209_vm7 = vmor %vm1207_vm0, %vm1208_vm6 }
0x218d   :  { %v1204_v24 = vsub.f32 1.0, %v1203_v23 }
0x218f   :  { %v1205_v0 = vmul.f32 %v1468_v22, %v1204_v24 }
0x2191   :  { %v1206_v25 = vadd.f32 %v1468_v22, %v1205_v0 }
0x2193   :  { %v1210_v8 = vsel %vm1209_vm7, %v1468_v22, %v1206_v25 }
0x2194   :  { %v1215_v29 = vsel %vm1212_vm8, %v1214_v27, %v1210_v8 }
0x2195   :  { %v1228_v38 = vsub.f32 1.0, %v1215_v29  ;;  %v1234_v40 = vmul.f32 %v1215_v29, %v1170_v9 }
0x21e9   :  { %v1219_v28 = vpop.permute.xlu1 %1218 }
0x21ea   :  { %v1221_v30 = vmul.f32 %v1219_v28, %v1215_v29 }
0x21ec   :  { %1223 = vrot.lane.b32.xlu2 %v1221_v30, %s1587_s2 }
0x21f4   :  { %1367 = vrot.lane.b32.xlu2 %v1366_v37, %s1604_s29 }
0x2246   :  { %v1224_v31 = vpop.permute.xlu2 %1223 }
0x2247   :  { %v1226_v33 = vadd.f32 %v1224_v31, %v1171_v18 }
0x2249   :  { %1469 = vtanh.f32 %v1226_v33 }
0x224e   :  { %v1368_v44 = vpop.permute.xlu2 %1367 }
0x224f   :  { %v1470_v34 = vpop.eup %1469  ;;  %v1370_v45 = vunpack.i.h.bf16 %v1368_v44  ;;  %v1369_v46 = vunpack.i.l.bf16 %v1368_v44 }
0x2250   :  { %1230 = vrot.lane.b32.xlu1 %v1470_v34, %s1588_s28 }
0x2251   :  { %1265 = vmatpush.msra.mxu0 %v1369_v46 }
0x2253   :  { %1266 = vmatpush.msra.mxu0 %v1370_v45 }
0x22c2   :  { %v1231_v39 = vpop.permute.xlu1 %1230 }
0x22c3   :  { %v1233_v41 = vmul.f32 %v1231_v39, %v1228_v38 }
0x22c5   :  { %v1235_v42 = vadd.f32 %v1234_v40, %v1233_v41 }
0x22c7   :  { %v1236_v43 = vmax.f32 %v1235_v42, 0.0 }
0x22c9   :  { %1239 = vrot.lane.b32.xlu0 %v1236_v43, %s1588_s28 }
0x233b   :  { %v1240_v5 = vpop.permute.xlu0 %1239 }
0x233c   :  { %1322 = vmatmul.msk.f32.vlgmr.msra.gmra.mxu0 %vm198_vm5, %v1240_v5 }
0x23b9   :  { %v1268_v6 = vpop.f32.mrf.mxu0 }
0x23ba   :  { %v1269_v48 = vadd.f32 %v1374_v47, %v1268_v6 }
0x23bc   :  { %1272 = vst.msk [vmem:[#allocation9] sm:$0xff] %vm1271_vm9, %v1269_v48 }
0x23bd   :  { %1283 = dma.vmem_to_hbm [thread:$0]  %s1279_s4, 128, %s1281_s7, [#allocation5]  }
0x23be   :  { %1577 = dma.done.wait [#allocation5], 128  }
0x23bf   :  { %1578 = vsyncadd [#allocation5], 4294967168 }
0x23c0   :  { %1288 = vsyncpa [#allocation4], 1 }
0x23c1   :  { %1289 = vsyncpa [#allocation7], 1 }
0x23c2   :  { %1290 = vsyncpa [#allocation5], 1 }

</bundles_post_ra>
